<compile_context>
chip_gen: v7x
topology: tpu7x:2x2x1
jax: 0.10.0
libtpu: 0.0.40
codegen_flags: <defaults>
</compile_context>

<pallas_src>
import jax
import jax.numpy as jnp
from jax import lax
from jax.experimental import pallas as pl
from jax.experimental.pallas import tpu as pltpu

MATMUL_DTYPE = jnp.bfloat16      # MXU operand dtype (full rate on v5e/v6e/v7x)
STREAM_DTYPE = jnp.bfloat16      # dtype of the HBM<->VMEM streams (q/k/v/z/out)


# ----------------------------------------------------------------------------
# Pallas kernel: chunked causal linear attention + fused silu(z) output gate
# ----------------------------------------------------------------------------
def _make_linattn_kernel(heads_per_block: int, d_head: int, d_v: int):
    """Per grid step (b, g, i):
       q_ref, k_ref: (1, C, heads_per_block*d_head)  streamed dtype
       v_ref, z_ref: (1, C, heads_per_block*d_v)     streamed dtype
       o_ref:        (1, C, heads_per_block*d_v)     streamed dtype
       kv_ref:       (heads_per_block, d_head, d_v) f32  running sum k v^T
       ksum_ref:     (heads_per_block, 1, d_head)   f32  running sum k
    The chunk axis (i) is the innermost, sequential ("arbitrary") grid axis;
    the carry is reset at i == 0.  Reordering that axis or marking it
    parallel would break causality.
    """

    def kernel(q_ref, k_ref, v_ref, z_ref, o_ref, kv_ref, ksum_ref):
        C = q_ref.shape[1]

        @pl.when(pl.program_id(2) == 0)   # first chunk of this (batch, head-group)
        def _():
            kv_ref[...] = jnp.zeros_like(kv_ref)
            ksum_ref[...] = jnp.zeros_like(ksum_ref)

        # elu(x) + 1 in f32 (inputs are streamed in bf16).
        qf = q_ref[0].astype(jnp.float32)
        kf = k_ref[0].astype(jnp.float32)
        qf = jnp.where(qf > 0, qf + 1.0, jnp.exp(qf))
        kf = jnp.where(kf > 0, kf + 1.0, jnp.exp(kf))
        q_m = qf.astype(MATMUL_DTYPE)
        k_m = kf.astype(MATMUL_DTYPE)

        # v is only ever an MXU rhs: consume it in its streamed dtype.
        v_m = v_ref[0]
        if v_m.dtype != MATMUL_DTYPE:
            v_m = v_m.astype(MATMUL_DTYPE)

        # causal (inclusive-diagonal) mask for the intra-chunk block
        row = lax.broadcasted_iota(jnp.int32, (C, C), 0)
        col = lax.broadcasted_iota(jnp.int32, (C, C), 1)
        causal = col <= row

        for h in range(heads_per_block):          # static unroll; small
            qs, qe = h * d_head, (h + 1) * d_head
            vs, ve = h * d_v, (h + 1) * d_v
            qh_f = qf[:, qs:qe]
            kh_f = kf[:, qs:qe]
            qh_m = q_m[:, qs:qe]
            kh_m = k_m[:, qs:qe]
            vh_m = v_m[:, vs:ve]

            kv_old = kv_ref[h]                    # (d_head, d_v) f32
            ksum_old = ksum_ref[h]                # (1, d_head)   f32

            # intra-chunk scores (C, C), f32 accumulation on the MXU
            s = lax.dot_general(qh_m, kh_m, (((1,), (1,)), ((), ())),
                                preferred_element_type=jnp.float32)
            s = jnp.where(causal, s, 0.0)

            # numerator: masked_scores @ V  +  q @ KV_state        -> (C, d_v)
            num = jnp.dot(s.astype(MATMUL_DTYPE), vh_m,
                          preferred_element_type=jnp.float32)
            num = num + jnp.dot(qh_m, kv_old.astype(MATMUL_DTYPE),
                                preferred_element_type=jnp.float32)

            # denominator nu_t = sum_{s<=t} q_t . k_s              -> (C, 1)
            nu = (jnp.sum(s, axis=-1, keepdims=True)
                  + jnp.sum(qh_f * ksum_old, axis=-1, keepdims=True))

            # normalize AFTER the matmuls (EUP reciprocal, no (S,S) divide)
            ctx_h = num * pl.reciprocal(nu, approx=True)

            # fused MHA_MAMBA output gate: ctx * silu(z), written straight
            # into this head's output lane slice (no concat temporary).
            zf = z_ref[0, :, vs:ve].astype(jnp.float32)
            gate = zf * (1.0 / (1.0 + jnp.exp(-zf)))
            o_ref[0, :, vs:ve] = (ctx_h * gate).astype(o_ref.dtype)

            # carry update with the *current* chunk's k/v (outputs above used
            # the pre-update state, so cross-chunk causality is exact).
            # Contracting dim 0 keeps the transpose inside the MXU feed.
            kv_ref[h] = kv_old + lax.dot_general(
                kh_m, vh_m, (((0,), (0,)), ((), ())),
                preferred_element_type=jnp.float32)
            ksum_ref[h] = ksum_old + jnp.sum(kh_f, axis=0, keepdims=True)

        # TODO(synk): training-mode attention dropout (p > 0) not implemented
        # (eval mode / p = 0 is the identity).

    return kernel


def lin_attention_gated(qk, v, z, *, num_heads, chunk=256, head_parallel=None):
    """silu(z) * SelfLinAttention(q, k, v), with q/k packed as qk = [q | k].

    qk: (B, S, 2*d_qk) ('(two h d)' layout of Wqk's output); v, z: (B, S, d_model).
    Returns (B, S, d_model) in bf16.

    chunk: 256 fills the 256-wide v6e/v7x MXU; use 128 on v5e (128-wide MXU).
    head_parallel: one head per grid block (grid (B, H, S/C)) so megacore
    sharding has >1 parallel item when B < 2 (v7x).  Auto-enabled when B < 2
    and the per-head widths are 128-lane aligned.
    """
    B, S, two_d_qk = qk.shape
    d_qk = two_d_qk // 2
    d_model = v.shape[-1]
    assert d_qk % num_heads == 0 and d_model % num_heads == 0
    d_head = d_qk // num_heads
    d_v = d_model // num_heads
    C = min(chunk, S)
    assert S % C == 0, "sequence length must be a multiple of the chunk size"
    assert C % 8 == 0 or C == S, "chunk must be a multiple of 8 (sublane tiling)"
    assert d_qk % 128 == 0, "d_qk must be a multiple of the 128-lane width"

    if head_parallel is None:
        head_parallel = (B < 2 and num_heads > 1
                         and d_head % 128 == 0 and d_v % 128 == 0)
    n_groups = num_heads if head_parallel else 1
    hpb = num_heads // n_groups           # heads per block

    # The kernel is HBM-bandwidth bound: stream everything in bf16.
    qk = qk.astype(STREAM_DTYPE)
    v = v.astype(STREAM_DTYPE)
    z = z.astype(STREAM_DTYPE)

    # qk is passed twice; the q spec grabs lane-blocks [0, n_groups), the k
    # spec grabs [n_groups, 2*n_groups) of the fused last dim -> no wrapper
    # split copies and no extra HBM traffic (each spec DMAs only its half).
    q_spec = pl.BlockSpec((1, C, hpb * d_head), lambda b, g, i: (b, i, g))
    k_spec = pl.BlockSpec((1, C, hpb * d_head), lambda b, g, i: (b, i, n_groups + g))
    v_spec = pl.BlockSpec((1, C, hpb * d_v), lambda b, g, i: (b, i, g))

    # Raise the scoped-VMEM limit only when the double-buffered tiles would
    # actually exceed the 32 MiB default (large chunk and/or d_model).
    io_tile_bytes = (2 * C * hpb * d_head + 3 * C * hpb * d_v) * 2     # bf16
    scratch_bytes = hpb * (d_head * d_v + 8 * d_head) * 4
    needed = 2 * (2 * io_tile_bytes) + scratch_bytes                   # 2x headroom
    cp = dict(dimension_semantics=("parallel", "parallel", "arbitrary"))
    if needed > (32 << 20):
        cp["vmem_limit_bytes"] = int(min(needed, 100 << 20))

    return pl.pallas_call(
        _make_linattn_kernel(hpb, d_head, d_v),
        out_shape=jax.ShapeDtypeStruct((B, S, d_model), STREAM_DTYPE),
        grid=(B, n_groups, S // C),
        in_specs=[q_spec, k_spec, v_spec, v_spec],
        out_specs=v_spec,
        scratch_shapes=[
            pltpu.VMEM((hpb, d_head, d_v), jnp.float32),   # running KV state
            pltpu.VMEM((hpb, 1, d_head), jnp.float32),     # running k-sum
        ],
        compiler_params=pltpu.CompilerParams(**cp),
    )(qk, qk, v, z)


# ----------------------------------------------------------------------------
# MHA_MAMBA wrapper (projections / depthwise causal conv in plain XLA)
# ----------------------------------------------------------------------------
def _causal_conv1d_silu(x, w, b):
    """Depthwise causal conv along the sequence axis followed by SiLU.

    x: (B, S, D); w: (D, W) with w[:, -1] hitting the current timestep; b: (D,)
    """
    # TODO(synk): the original code hands x to causal_conv1d_fn as (B, S, D)
    # while that op expects (B, D, S); this implements the intended depthwise
    # causal conv over the sequence dimension.
    S, W = x.shape[1], w.shape[1]
    xp = jnp.pad(x, ((0, 0), (W - 1, 0), (0, 0)))
    y = b
    for i in range(W):
        y = y + xp[:, i:i + S, :] * w[:, i]
    return y * (1.0 / (1.0 + jnp.exp(-y)))           # SiLU


def init_mha_mamba_params(key, d_model, d_qk, d_conv):
    ks = jax.random.split(key, 7)

    def lin(k, fan_in, fan_out):
        return jax.random.normal(k, (fan_in, fan_out), jnp.float32) / jnp.sqrt(fan_in)

    return {
        "in_proj_w": lin(ks[0], d_model, 2 * d_model),            # bias=False
        "conv_w": jax.random.normal(ks[1], (d_model, d_conv), jnp.float32)
                  / jnp.sqrt(d_conv),
        "conv_b": 0.1 * jax.random.normal(ks[2], (d_model,), jnp.float32),
        "wqk_w": lin(ks[3], d_model, 2 * d_qk),                   # bias=False
        "wv_w": lin(ks[4], d_model, d_model),                     # bias=False
        "out_proj_w": lin(ks[5], d_model, d_model),
        "out_proj_b": 0.1 * jax.random.normal(ks[6], (d_model,), jnp.float32),
    }


def mha_mamba_forward(params, x, *, num_heads, chunk=256, head_parallel=None):
    """x: (B, S, d_model) -> (B, S, d_model). Mirrors MHA_MAMBA.forward (eval)."""
    d_model = x.shape[-1]
    w_in = params["in_proj_w"]
    # issue in_proj as two matmuls so xz is never split (no HBM copy for z)
    xc = x @ w_in[:, :d_model]
    z = x @ w_in[:, d_model:]
    xc = _causal_conv1d_silu(xc, params["conv_w"], params["conv_b"])
    qk = xc @ params["wqk_w"]     # fused [q | k]; split by lane slices in-kernel
    v = xc @ params["wv_w"]
    gated = lin_attention_gated(qk, v, z, num_heads=num_heads, chunk=chunk,
                                head_parallel=head_parallel)
    # out_proj consumes the bf16 gated context directly, f32 accumulation
    return jnp.dot(gated, params["out_proj_w"],
                   preferred_element_type=jnp.float32) + params["out_proj_b"]


# ----------------------------------------------------------------------------
# Pure-JAX f32 reference (quadratic SelfLinAttention, mirrors the PyTorch code)
# ----------------------------------------------------------------------------
def _reference_forward(params, x, *, num_heads):
    xz = x @ params["in_proj_w"]
    xc, zgate = jnp.split(xz, 2, axis=-1)
    xc = _causal_conv1d_silu(xc, params["conv_w"], params["conv_b"])
    qk = xc @ params["wqk_w"]
    d_qk = qk.shape[-1] // 2
    q, k = qk[..., :d_qk], qk[..., d_qk:]
    v = xc @ params["wv_w"]
    B, S, d_model = v.shape
    H = num_heads
    q = q.reshape(B, S, H, d_qk // H)
    k = k.reshape(B, S, H, d_qk // H)
    vh = v.reshape(B, S, H, d_model // H)
    q = jnp.where(q > 0, q + 1.0, jnp.exp(q))        # elu + 1
    k = jnp.where(k > 0, k + 1.0, jnp.exp(k))
    scores = jnp.einsum("bthd,bshd->bhts", q, k)
    scores = scores * jnp.tril(jnp.ones((S, S), scores.dtype))
    nu = scores.sum(axis=-1, keepdims=True)
    attn = scores / nu
    ctx = jnp.einsum("bhts,bshd->bthd", attn, vh).reshape(B, S, d_model)
    gated = ctx * (zgate * (1.0 / (1.0 + jnp.exp(-zgate))))
    return gated @ params["out_proj_w"] + params["out_proj_b"]


if __name__ == "__main__":
    # head_dim = 128 keeps every per-head lane slice aligned to the native
    # 128-lane width; everything else is kept small.
    B, S, d_model, num_heads, d_conv = 2, 16, 256, 2, 4
    key = jax.random.PRNGKey(0)
    kp, kx = jax.random.split(key)
    params = init_mha_mamba_params(kp, d_model, d_model, d_conv)   # d_qk = d_model
    x = jax.random.normal(kx, (B, S, d_model), dtype=jnp.float32)
    ref = _reference_forward(params, x, num_heads=num_heads)

    # Path 1: batched grid (heads looped inside the block); chunk=8 -> two
    # chunks per sequence, exercising the cross-chunk KV carry.
    out = mha_mamba_forward(params, x, num_heads=num_heads, chunk=8)
    out = jax.block_until_ready(out)
    assert out.shape == (B, S, d_model)
    # bf16 streamed I/O + bf16 MXU operands + approx reciprocal -> loosened
    # tolerance vs the f32 reference.
    assert jnp.allclose(out, ref, atol=8e-2, rtol=8e-2), (
        "batched path mismatch vs reference: max abs err "
        f"{float(jnp.max(jnp.abs(out - ref)))}")

    # Path 2: B=1 -> head-parallel grid (one head per block, megacore-friendly).
    out1 = mha_mamba_forward(params, x[:1], num_heads=num_heads, chunk=8)
    out1 = jax.block_until_ready(out1)
    assert jnp.allclose(out1, ref[:1], atol=8e-2, rtol=8e-2), (
        "head-parallel path mismatch vs reference: max abs err "
        f"{float(jnp.max(jnp.abs(out1 - ref[:1])))}")

    print("KERNEL_OK")
</pallas_src>

<mosaic_0001>
module attributes {stable_mosaic.version = 11 : i64} {
  func.func @kernel(%arg0: i32, %arg1: i32, %arg2: i32, %arg3: memref<1x8x256xbf16, #tpu.memory_space<vmem>>, %arg4: memref<1x8x256xbf16, #tpu.memory_space<vmem>>, %arg5: memref<1x8x256xbf16, #tpu.memory_space<vmem>>, %arg6: memref<1x8x256xbf16, #tpu.memory_space<vmem>>, %arg7: memref<1x8x256xbf16, #tpu.memory_space<vmem>>, %arg8: memref<2x128x128xf32, #tpu.memory_space<vmem>>, %arg9: memref<2x1x128xf32, #tpu.memory_space<vmem>>) attributes {dimension_semantics = [#tpu.dimension_semantics<parallel>, #tpu.dimension_semantics<parallel>, #tpu.dimension_semantics<arbitrary>], iteration_bounds = array<i64: 2, 1, 2>, scalar_prefetch = 0 : i64, scratch_operands = 2 : i64, tpu.core_type = #tpu.core_type<tc>, window_params = [{transform_indices = @transform_0, window_bounds = array<i64: 1, 8, 256>}, {transform_indices = @transform_1, window_bounds = array<i64: 1, 8, 256>}, {transform_indices = @transform_2, window_bounds = array<i64: 1, 8, 256>}, {transform_indices = @transform_3, window_bounds = array<i64: 1, 8, 256>}, {transform_indices = @transform_4, window_bounds = array<i64: 1, 8, 256>}]} {
    %c0_i32 = arith.constant 0 : i32
    %0 = arith.cmpi eq, %arg2, %c0_i32 : i32
    %1 = arith.extui %0 : i1 to i32
    %c0_i32_0 = arith.constant 0 : i32
    %2 = arith.cmpi ne, %1, %c0_i32_0 : i32
    scf.if %2 {
      %cst_68 = arith.constant 0.000000e+00 : f32
      %136 = vector.broadcast %cst_68 : f32 to vector<2x128x128xf32>
      %c0_69 = arith.constant 0 : index
      %c0_70 = arith.constant 0 : index
      %c0_71 = arith.constant 0 : index
      %137 = vector.load %arg8[%c0_69, %c0_70, %c0_71] : memref<2x128x128xf32, #tpu.memory_space<vmem>>, vector<2x128x128xf32>
      tpu.vector_store %arg8[%c0_69, %c0_70, %c0_71], %136 {strides = array<i32>} : memref<2x128x128xf32, #tpu.memory_space<vmem>>, vector<2x128x128xf32>,
      %cst_72 = arith.constant 0.000000e+00 : f32
      %138 = vector.broadcast %cst_72 : f32 to vector<2x1x128xf32>
      %c0_73 = arith.constant 0 : index
      %c0_74 = arith.constant 0 : index
      %c0_75 = arith.constant 0 : index
      %139 = vector.load %arg9[%c0_73, %c0_74, %c0_75] : memref<2x1x128xf32, #tpu.memory_space<vmem>>, vector<2x1x128xf32>
      tpu.vector_store %arg9[%c0_73, %c0_74, %c0_75], %138 {strides = array<i32>} : memref<2x1x128xf32, #tpu.memory_space<vmem>>, vector<2x1x128xf32>,
    } else {
    }
    %c0 = arith.constant 0 : index
    %c0_1 = arith.constant 0 : index
    %c0_2 = arith.constant 0 : index
    %3 = vector.load %arg3[%c0, %c0_1, %c0_2] : memref<1x8x256xbf16, #tpu.memory_space<vmem>>, vector<1x8x256xbf16>
    %4 = vector.shape_cast %3 : vector<1x8x256xbf16> to vector<8x256xbf16>
    %5 = arith.extf %4 : vector<8x256xbf16> to vector<8x256xf32>
    %c0_3 = arith.constant 0 : index
    %c0_4 = arith.constant 0 : index
    %c0_5 = arith.constant 0 : index
    %6 = vector.load %arg4[%c0_3, %c0_4, %c0_5] : memref<1x8x256xbf16, #tpu.memory_space<vmem>>, vector<1x8x256xbf16>
    %7 = vector.shape_cast %6 : vector<1x8x256xbf16> to vector<8x256xbf16>
    %8 = arith.extf %7 : vector<8x256xbf16> to vector<8x256xf32>
    %cst = arith.constant 0.000000e+00 : f32
    %9 = vector.broadcast %cst : f32 to vector<8x256xf32>
    %10 = arith.cmpf ogt, %5, %9 : vector<8x256xf32>
    %cst_6 = arith.constant 1.000000e+00 : f32
    %11 = vector.broadcast %cst_6 : f32 to vector<8x256xf32>
    %12 = arith.addf %5, %11 : vector<8x256xf32>
    %13 = math.exp %5 : vector<8x256xf32>
    %14 = arith.select %10, %12, %13 : vector<8x256xi1>, vector<8x256xf32>
    %cst_7 = arith.constant 0.000000e+00 : f32
    %15 = vector.broadcast %cst_7 : f32 to vector<8x256xf32>
    %16 = arith.cmpf ogt, %8, %15 : vector<8x256xf32>
    %cst_8 = arith.constant 1.000000e+00 : f32
    %17 = vector.broadcast %cst_8 : f32 to vector<8x256xf32>
    %18 = arith.addf %8, %17 : vector<8x256xf32>
    %19 = math.exp %8 : vector<8x256xf32>
    %20 = arith.select %16, %18, %19 : vector<8x256xi1>, vector<8x256xf32>
    %21 = arith.truncf %14 : vector<8x256xf32> to vector<8x256xbf16>
    %22 = arith.truncf %20 : vector<8x256xf32> to vector<8x256xbf16>
    %c0_9 = arith.constant 0 : index
    %c0_10 = arith.constant 0 : index
    %c0_11 = arith.constant 0 : index
    %23 = vector.load %arg5[%c0_9, %c0_10, %c0_11] : memref<1x8x256xbf16, #tpu.memory_space<vmem>>, vector<1x8x256xbf16>
    %24 = vector.shape_cast %23 : vector<1x8x256xbf16> to vector<8x256xbf16>
    %25 = tpu.iota {dimensions = array<i32: 0>} : vector<8x8xi32>
    %26 = tpu.iota {dimensions = array<i32: 1>} : vector<8x8xi32>
    %27 = arith.cmpi sle, %26, %25 : vector<8x8xi32>
    %28 = vector.extract_strided_slice %14 {offsets = [0, 0], sizes = [8, 128], strides = [1, 1]} : vector<8x256xf32> to vector<8x128xf32>
    %29 = vector.extract_strided_slice %20 {offsets = [0, 0], sizes = [8, 128], strides = [1, 1]} : vector<8x256xf32> to vector<8x128xf32>
    %30 = vector.extract_strided_slice %21 {offsets = [0, 0], sizes = [8, 128], strides = [1, 1]} : vector<8x256xbf16> to vector<8x128xbf16>
    %31 = vector.extract_strided_slice %22 {offsets = [0, 0], sizes = [8, 128], strides = [1, 1]} : vector<8x256xbf16> to vector<8x128xbf16>
    %32 = vector.extract_strided_slice %24 {offsets = [0, 0], sizes = [8, 128], strides = [1, 1]} : vector<8x256xbf16> to vector<8x128xbf16>
    %c0_12 = arith.constant 0 : index
    %c0_13 = arith.constant 0 : index
    %c0_14 = arith.constant 0 : index
    %33 = vector.load %arg8[%c0_12, %c0_13, %c0_14] : memref<2x128x128xf32, #tpu.memory_space<vmem>>, vector<1x128x128xf32>
    %34 = vector.shape_cast %33 : vector<1x128x128xf32> to vector<128x128xf32>
    %c0_15 = arith.constant 0 : index
    %c0_16 = arith.constant 0 : index
    %c0_17 = arith.constant 0 : index
    %35 = vector.load %arg9[%c0_15, %c0_16, %c0_17] : memref<2x1x128xf32, #tpu.memory_space<vmem>>, vector<1x1x128xf32>
    %36 = vector.shape_cast %35 : vector<1x1x128xf32> to vector<1x128xf32>
    %cst_18 = arith.constant dense<0.000000e+00> : vector<8x8xf32>
    %37 = tpu.matmul %30, %31, %cst_18 {dimension_numbers = #tpu.dot_dimension_numbers<[1], [1], [0], [0], [0, 0, 1, 0], [], []>} : vector<8x128xbf16>, vector<8x128xbf16>, vector<8x8xf32> -> vector<8x8xf32>
    %cst_19 = arith.constant 0.000000e+00 : f32
    %38 = vector.broadcast %cst_19 : f32 to vector<8x8xf32>
    %39 = arith.select %27, %37, %38 : vector<8x8xi1>, vector<8x8xf32>
    %40 = arith.truncf %39 : vector<8x8xf32> to vector<8x8xbf16>
    %cst_20 = arith.constant dense<0.000000e+00> : vector<8x128xf32>
    %41 = tpu.matmul %40, %32, %cst_20 {dimension_numbers = #tpu.dot_dimension_numbers<[1], [0], [0], [1], [0, 0, 1, 1], [], []>} : vector<8x8xbf16>, vector<8x128xbf16>, vector<8x128xf32> -> vector<8x128xf32>
    %42 = arith.truncf %34 : vector<128x128xf32> to vector<128x128xbf16>
    %cst_21 = arith.constant dense<0.000000e+00> : vector<8x128xf32>
    %43 = tpu.matmul %30, %42, %cst_21 {dimension_numbers = #tpu.dot_dimension_numbers<[1], [0], [0], [1], [0, 0, 1, 1], [], []>} : vector<8x128xbf16>, vector<128x128xbf16>, vector<8x128xf32> -> vector<8x128xf32>
    %44 = arith.addf %41, %43 : vector<8x128xf32>
    %cst_22 = arith.constant dense<0.000000e+00> : vector<8xf32>
    %45 = vector.multi_reduction <add>, %39, %cst_22 [1] : vector<8x8xf32> to vector<8xf32>
    %46 = vector.shape_cast %45 : vector<8xf32> to vector<8x1xf32>
    %47 = vector.broadcast %36 : vector<1x128xf32> to vector<8x128xf32>
    %48 = arith.mulf %28, %47 : vector<8x128xf32>
    %cst_23 = arith.constant dense<0.000000e+00> : vector<8xf32>
    %49 = vector.multi_reduction <add>, %48, %cst_23 [1] : vector<8x128xf32> to vector<8xf32>
    %50 = vector.shape_cast %49 : vector<8xf32> to vector<8x1xf32>
    %51 = arith.addf %46, %50 : vector<8x1xf32>
    %52 = tpu.reciprocal %51 {approx = true} : vector<8x1xf32> -> vector<8x1xf32>
    %53 = vector.broadcast %52 : vector<8x1xf32> to vector<8x128xf32>
    %54 = arith.mulf %44, %53 : vector<8x128xf32>
    %c0_24 = arith.constant 0 : index
    %c0_25 = arith.constant 0 : index
    %c0_26 = arith.constant 0 : index
    %55 = vector.load %arg6[%c0_24, %c0_25, %c0_26] : memref<1x8x256xbf16, #tpu.memory_space<vmem>>, vector<1x8x128xbf16>
    %56 = vector.shape_cast %55 : vector<1x8x128xbf16> to vector<8x128xbf16>
    %57 = arith.extf %56 : vector<8x128xbf16> to vector<8x128xf32>
    %cst_27 = arith.constant 0.000000e+00 : f32
    %58 = vector.broadcast %cst_27 : f32 to vector<8x128xf32>
    %59 = arith.subf %58, %57 : vector<8x128xf32>
    %60 = math.exp %59 : vector<8x128xf32>
    %cst_28 = arith.constant 1.000000e+00 : f32
    %61 = vector.broadcast %cst_28 : f32 to vector<8x128xf32>
    %62 = arith.addf %61, %60 : vector<8x128xf32>
    %cst_29 = arith.constant 1.000000e+00 : f32
    %63 = vector.broadcast %cst_29 : f32 to vector<8x128xf32>
    %64 = arith.divf %63, %62 : vector<8x128xf32>
    %65 = arith.mulf %57, %64 : vector<8x128xf32>
    %66 = arith.mulf %54, %65 : vector<8x128xf32>
    %67 = arith.truncf %66 : vector<8x128xf32> to vector<8x128xbf16>
    %c0_30 = arith.constant 0 : index
    %c0_31 = arith.constant 0 : index
    %c0_32 = arith.constant 0 : index
    %68 = vector.load %arg7[%c0_30, %c0_31, %c0_32] : memref<1x8x256xbf16, #tpu.memory_space<vmem>>, vector<1x8x128xbf16>
    %69 = vector.shape_cast %68 : vector<1x8x128xbf16> to vector<8x128xbf16>
    %70 = vector.shape_cast %67 : vector<8x128xbf16> to vector<1x8x128xbf16>
    tpu.vector_store %arg7[%c0_30, %c0_31, %c0_32], %70 {strides = array<i32>} : memref<1x8x256xbf16, #tpu.memory_space<vmem>>, vector<1x8x128xbf16>,
    %cst_33 = arith.constant dense<0.000000e+00> : vector<128x128xf32>
    %71 = tpu.matmul %31, %32, %cst_33 {dimension_numbers = #tpu.dot_dimension_numbers<[0], [0], [1], [1], [0, 1, 1, 1], [], []>} : vector<8x128xbf16>, vector<8x128xbf16>, vector<128x128xf32> -> vector<128x128xf32>
    %72 = arith.addf %34, %71 : vector<128x128xf32>
    %c0_34 = arith.constant 0 : index
    %c0_35 = arith.constant 0 : index
    %c0_36 = arith.constant 0 : index
    %73 = vector.load %arg8[%c0_34, %c0_35, %c0_36] : memref<2x128x128xf32, #tpu.memory_space<vmem>>, vector<1x128x128xf32>
    %74 = vector.shape_cast %73 : vector<1x128x128xf32> to vector<128x128xf32>
    %75 = vector.shape_cast %72 : vector<128x128xf32> to vector<1x128x128xf32>
    tpu.vector_store %arg8[%c0_34, %c0_35, %c0_36], %75 {strides = array<i32>} : memref<2x128x128xf32, #tpu.memory_space<vmem>>, vector<1x128x128xf32>,
    %cst_37 = arith.constant dense<0.000000e+00> : vector<128xf32>
    %76 = vector.multi_reduction <add>, %29, %cst_37 [0] : vector<8x128xf32> to vector<128xf32>
    %77 = vector.shape_cast %76 : vector<128xf32> to vector<1x128xf32>
    %78 = arith.addf %36, %77 : vector<1x128xf32>
    %c0_38 = arith.constant 0 : index
    %c0_39 = arith.constant 0 : index
    %c0_40 = arith.constant 0 : index
    %79 = vector.load %arg9[%c0_38, %c0_39, %c0_40] : memref<2x1x128xf32, #tpu.memory_space<vmem>>, vector<1x1x128xf32>
    %80 = vector.shape_cast %79 : vector<1x1x128xf32> to vector<1x128xf32>
    %81 = vector.shape_cast %78 : vector<1x128xf32> to vector<1x1x128xf32>
    tpu.vector_store %arg9[%c0_38, %c0_39, %c0_40], %81 {strides = array<i32>} : memref<2x1x128xf32, #tpu.memory_space<vmem>>, vector<1x1x128xf32>,
    %82 = vector.extract_strided_slice %14 {offsets = [0, 128], sizes = [8, 128], strides = [1, 1]} : vector<8x256xf32> to vector<8x128xf32>
    %83 = vector.extract_strided_slice %20 {offsets = [0, 128], sizes = [8, 128], strides = [1, 1]} : vector<8x256xf32> to vector<8x128xf32>
    %84 = vector.extract_strided_slice %21 {offsets = [0, 128], sizes = [8, 128], strides = [1, 1]} : vector<8x256xbf16> to vector<8x128xbf16>
    %85 = vector.extract_strided_slice %22 {offsets = [0, 128], sizes = [8, 128], strides = [1, 1]} : vector<8x256xbf16> to vector<8x128xbf16>
    %86 = vector.extract_strided_slice %24 {offsets = [0, 128], sizes = [8, 128], strides = [1, 1]} : vector<8x256xbf16> to vector<8x128xbf16>
    %c1 = arith.constant 1 : index
    %c0_41 = arith.constant 0 : index
    %c0_42 = arith.constant 0 : index
    %87 = vector.load %arg8[%c1, %c0_41, %c0_42] : memref<2x128x128xf32, #tpu.memory_space<vmem>>, vector<1x128x128xf32>
    %88 = vector.shape_cast %87 : vector<1x128x128xf32> to vector<128x128xf32>
    %c1_43 = arith.constant 1 : index
    %c0_44 = arith.constant 0 : index
    %c0_45 = arith.constant 0 : index
    %89 = vector.load %arg9[%c1_43, %c0_44, %c0_45] : memref<2x1x128xf32, #tpu.memory_space<vmem>>, vector<1x1x128xf32>
    %90 = vector.shape_cast %89 : vector<1x1x128xf32> to vector<1x128xf32>
    %cst_46 = arith.constant dense<0.000000e+00> : vector<8x8xf32>
    %91 = tpu.matmul %84, %85, %cst_46 {dimension_numbers = #tpu.dot_dimension_numbers<[1], [1], [0], [0], [0, 0, 1, 0], [], []>} : vector<8x128xbf16>, vector<8x128xbf16>, vector<8x8xf32> -> vector<8x8xf32>
    %cst_47 = arith.constant 0.000000e+00 : f32
    %92 = vector.broadcast %cst_47 : f32 to vector<8x8xf32>
    %93 = arith.select %27, %91, %92 : vector<8x8xi1>, vector<8x8xf32>
    %94 = arith.truncf %93 : vector<8x8xf32> to vector<8x8xbf16>
    %cst_48 = arith.constant dense<0.000000e+00> : vector<8x128xf32>
    %95 = tpu.matmul %94, %86, %cst_48 {dimension_numbers = #tpu.dot_dimension_numbers<[1], [0], [0], [1], [0, 0, 1, 1], [], []>} : vector<8x8xbf16>, vector<8x128xbf16>, vector<8x128xf32> -> vector<8x128xf32>
    %96 = arith.truncf %88 : vector<128x128xf32> to vector<128x128xbf16>
    %cst_49 = arith.constant dense<0.000000e+00> : vector<8x128xf32>
    %97 = tpu.matmul %84, %96, %cst_49 {dimension_numbers = #tpu.dot_dimension_numbers<[1], [0], [0], [1], [0, 0, 1, 1], [], []>} : vector<8x128xbf16>, vector<128x128xbf16>, vector<8x128xf32> -> vector<8x128xf32>
    %98 = arith.addf %95, %97 : vector<8x128xf32>
    %cst_50 = arith.constant dense<0.000000e+00> : vector<8xf32>
    %99 = vector.multi_reduction <add>, %93, %cst_50 [1] : vector<8x8xf32> to vector<8xf32>
    %100 = vector.shape_cast %99 : vector<8xf32> to vector<8x1xf32>
    %101 = vector.broadcast %90 : vector<1x128xf32> to vector<8x128xf32>
    %102 = arith.mulf %82, %101 : vector<8x128xf32>
    %cst_51 = arith.constant dense<0.000000e+00> : vector<8xf32>
    %103 = vector.multi_reduction <add>, %102, %cst_51 [1] : vector<8x128xf32> to vector<8xf32>
    %104 = vector.shape_cast %103 : vector<8xf32> to vector<8x1xf32>
    %105 = arith.addf %100, %104 : vector<8x1xf32>
    %106 = tpu.reciprocal %105 {approx = true} : vector<8x1xf32> -> vector<8x1xf32>
    %107 = vector.broadcast %106 : vector<8x1xf32> to vector<8x128xf32>
    %108 = arith.mulf %98, %107 : vector<8x128xf32>
    %c0_52 = arith.constant 0 : index
    %c0_53 = arith.constant 0 : index
    %c128 = arith.constant 128 : index
    %109 = vector.load %arg6[%c0_52, %c0_53, %c128] : memref<1x8x256xbf16, #tpu.memory_space<vmem>>, vector<1x8x128xbf16>
    %110 = vector.shape_cast %109 : vector<1x8x128xbf16> to vector<8x128xbf16>
    %111 = arith.extf %110 : vector<8x128xbf16> to vector<8x128xf32>
    %cst_54 = arith.constant 0.000000e+00 : f32
    %112 = vector.broadcast %cst_54 : f32 to vector<8x128xf32>
    %113 = arith.subf %112, %111 : vector<8x128xf32>
    %114 = math.exp %113 : vector<8x128xf32>
    %cst_55 = arith.constant 1.000000e+00 : f32
    %115 = vector.broadcast %cst_55 : f32 to vector<8x128xf32>
    %116 = arith.addf %115, %114 : vector<8x128xf32>
    %cst_56 = arith.constant 1.000000e+00 : f32
    %117 = vector.broadcast %cst_56 : f32 to vector<8x128xf32>
    %118 = arith.divf %117, %116 : vector<8x128xf32>
    %119 = arith.mulf %111, %118 : vector<8x128xf32>
    %120 = arith.mulf %108, %119 : vector<8x128xf32>
    %121 = arith.truncf %120 : vector<8x128xf32> to vector<8x128xbf16>
    %c0_57 = arith.constant 0 : index
    %c0_58 = arith.constant 0 : index
    %c128_59 = arith.constant 128 : index
    %122 = vector.load %arg7[%c0_57, %c0_58, %c128_59] : memref<1x8x256xbf16, #tpu.memory_space<vmem>>, vector<1x8x128xbf16>
    %123 = vector.shape_cast %122 : vector<1x8x128xbf16> to vector<8x128xbf16>
    %124 = vector.shape_cast %121 : vector<8x128xbf16> to vector<1x8x128xbf16>
    tpu.vector_store %arg7[%c0_57, %c0_58, %c128_59], %124 {strides = array<i32>} : memref<1x8x256xbf16, #tpu.memory_space<vmem>>, vector<1x8x128xbf16>,
    %cst_60 = arith.constant dense<0.000000e+00> : vector<128x128xf32>
    %125 = tpu.matmul %85, %86, %cst_60 {dimension_numbers = #tpu.dot_dimension_numbers<[0], [0], [1], [1], [0, 1, 1, 1], [], []>} : vector<8x128xbf16>, vector<8x128xbf16>, vector<128x128xf32> -> vector<128x128xf32>
    %126 = arith.addf %88, %125 : vector<128x128xf32>
    %c1_61 = arith.constant 1 : index
    %c0_62 = arith.constant 0 : index
    %c0_63 = arith.constant 0 : index
    %127 = vector.load %arg8[%c1_61, %c0_62, %c0_63] : memref<2x128x128xf32, #tpu.memory_space<vmem>>, vector<1x128x128xf32>
    %128 = vector.shape_cast %127 : vector<1x128x128xf32> to vector<128x128xf32>
    %129 = vector.shape_cast %126 : vector<128x128xf32> to vector<1x128x128xf32>
    tpu.vector_store %arg8[%c1_61, %c0_62, %c0_63], %129 {strides = array<i32>} : memref<2x128x128xf32, #tpu.memory_space<vmem>>, vector<1x128x128xf32>,
    %cst_64 = arith.constant dense<0.000000e+00> : vector<128xf32>
    %130 = vector.multi_reduction <add>, %83, %cst_64 [0] : vector<8x128xf32> to vector<128xf32>
    %131 = vector.shape_cast %130 : vector<128xf32> to vector<1x128xf32>
    %132 = arith.addf %90, %131 : vector<1x128xf32>
    %c1_65 = arith.constant 1 : index
    %c0_66 = arith.constant 0 : index
    %c0_67 = arith.constant 0 : index
    %133 = vector.load %arg9[%c1_65, %c0_66, %c0_67] : memref<2x1x128xf32, #tpu.memory_space<vmem>>, vector<1x1x128xf32>
    %134 = vector.shape_cast %133 : vector<1x1x128xf32> to vector<1x128xf32>
    %135 = vector.shape_cast %132 : vector<1x128xf32> to vector<1x1x128xf32>
    tpu.vector_store %arg9[%c1_65, %c0_66, %c0_67], %135 {strides = array<i32>} : memref<2x1x128xf32, #tpu.memory_space<vmem>>, vector<1x1x128xf32>,
    return
  }
  func.func @transform_0(%arg0: i32, %arg1: i32, %arg2: i32) -> (i32, i32, i32) {
    %c0_i32 = arith.constant 0 : i32
    return %arg0, %arg2, %arg1 : i32, i32, i32
  }
  func.func @transform_1(%arg0: i32, %arg1: i32, %arg2: i32) -> (i32, i32, i32) {
    %c1_i32 = arith.constant 1 : i32
    %0 = arith.addi %c1_i32, %arg1 : i32
    %c0_i32 = arith.constant 0 : i32
    return %arg0, %arg2, %0 : i32, i32, i32
  }
  func.func @transform_2(%arg0: i32, %arg1: i32, %arg2: i32) -> (i32, i32, i32) {
    %c0_i32 = arith.constant 0 : i32
    return %arg0, %arg2, %arg1 : i32, i32, i32
  }
  func.func @transform_3(%arg0: i32, %arg1: i32, %arg2: i32) -> (i32, i32, i32) {
    %c0_i32 = arith.constant 0 : i32
    return %arg0, %arg2, %arg1 : i32, i32, i32
  }
  func.func @transform_4(%arg0: i32, %arg1: i32, %arg2: i32) -> (i32, i32, i32) {
    %c0_i32 = arith.constant 0 : i32
    return %arg0, %arg2, %arg1 : i32, i32, i32
  }
}

</mosaic_0001>

<bundles_post_ra>
// kernel: tpu_custom_call.1
= control target key start
LH: loop header
LB: loop body
LE: loop exit
PB: predicated region body
PF: predicated region fallthrough
CT: control target
= control target key end

     0   :  { %s2552_s0 = inlined_call_operand.hbm [shape: bf16[2,16,512], index: 0, kind: input, shape index: {}]   ;;  %s2553_s1 = inlined_call_operand.hbm [shape: bf16[2,16,512], index: 1, kind: input, shape index: {}]   ;;  %s2554_s2 = inlined_call_operand.hbm [shape: bf16[2,16,256], index: 2, kind: input, shape index: {}]   ;;  %s2555_s3 = inlined_call_operand.hbm [shape: bf16[2,16,256], index: 3, kind: input, shape index: {}]   ;;  %s2556_s4 = inlined_call_operand.hbm [shape: bf16[2,16,256], index: 4, kind: output, shape index: {}]  }
   0x1   :  { %2566 = sst [smem:[#allocation23_spill]] %s2552_s0 }
   0x2   :  { %2567 = sst [smem:[#allocation24_spill]] %s2553_s1 }
   0x3   :  { %9 = vsyncpa [#allocation5], 0 }
   0x4   :  { %11 = vsyncpa [#allocation5 + $0x1], 0 }
   0x5   :  { %12 = vsyncpa [#allocation8], 0 }
   0x6   :  { %14 = vsyncpa [#allocation8 + $0x1], 0 }
   0x7   :  { %15 = vsyncpa [#allocation11], 0 }
   0x8   :  { %17 = vsyncpa [#allocation11 + $0x1], 0 }
   0x9   :  { %18 = vsyncpa [#allocation6], 0 }
   0xa   :  { %20 = vsyncpa [#allocation6 + $0x1], 0  ;;  %s1966_s15 = smov 0   ;;  %s1968_s16 = smov 0  }
   0xb   :  { %s1970_s17 = smov 0   ;;  %s1972_s18 = smov 0  }
   0xc   :  { %s1974_s19 = smov 0   ;;  %s1976_s20 = smov 0  }
   0xd   :  { %s1978_s21 = smov 0   ;;  %s1980_s22 = smov 0  }
   0xe LB: > { %2568 = sst [smem:[#allocation17_spill]] %s1903_s15  ;;  %s2007_s23 = sadd.s32 4294967295, %s1931_s22   ;;  %s1931_s22 = sphi %s1980_s22, %s26_s22   ;;  %s1927_s21 = sphi %s1978_s21, %s2600_s21   ;;  %s1923_s20 = sphi %s1976_s20, %s2599_s20   ;;  %s1919_s19 = sphi %s1974_s19, %s2598_s19   ;;  %s1915_s18 = sphi %s1972_s18, %s2597_s18   ;;  %s1911_s17 = sphi %s1970_s17, %s2592_s17   ;;  %s1907_s16 = sphi %s1968_s16, %s2596_s16   ;;  %s1903_s15 = sphi %s1966_s15, %s2595_s15  }
   0xf   : > { %2569 = sst [smem:[#allocation18_spill]] %s1911_s17  ;;  %s1381_s24 = sadd.s32 4294967294, %s1931_s22  }
  0x10   : > { %s38_s25 = sadd.s32 1, %s1923_s20  ;;  %s45_s26 = sadd.s32 1, %s1927_s21 }
  0x11   : > { %p39_p0 = scmp.ge.s32.totalorder %s38_s25, 2  ;;  %s56_s27 = sadd.s32 1, %s1911_s17 }
  0x12   : > { %p63_p1 = scmp.ne.s32.totalorder %s1911_s17, %s1907_s16  ;;  %p64_p2 = scmp.eq.s32.totalorder %s1931_s22, 0 }
  0x13   : > { %s2602_s25 = smov (%p39_p0, %s38_s25), 0  ;;  %s2604_s26 = smov (!%p39_p0, %s45_s26), %s1927_s21 }
  0x14   : > { %2570 = sst [smem:[#allocation19_spill]] %s2602_s25  ;;  %s50_s28 = ssub.s32 %s1923_s20, %s2602_s25 }
  0x15   : > { %p2021_p3 = por %p64_p2, %p63_p1  ;;  %p47_p4 = scmp.ge.s32.totalorder %s2604_s26, 2 }
  0x16   : > { %p69_p5 = scmp.ne.s32.totalorder %s1907_s16, %s1903_s15  ;;  %p70_p6 = scmp.eq.s32.totalorder %s2007_s23, 0 }
  0x17   : > { %p189_p7 = scmp.eq.s32.totalorder %s2007_s23, 3  ;;  %s2606_s26 = smov (%p47_p4, %s2604_s26), 0 }
  0x18   : > { %2572 = sst [smem:[#allocation20_spill]] %s2606_s26  ;;  %p2031_p8 = por %p70_p6, %p69_p5 }
  0x19   : > { %p2035_p9 = por %p189_p7, %p63_p1  ;;  %s49_s6 = ssub.s32 %s1927_s21, %s2606_s26 }
  0x1a   : > { %s2573_s30 = scalar_select %p2031_p8, 1, 0 }
  0x1b   : > { %s2574_s5 = scalar_select %p2035_p9, 1, 0 }
  0x1c   : > { %p195_p10 = scmp.eq.s32.totalorder %s1381_s24, 3  ;;  %s51_s7 = sor.u32 %s50_s28, %s49_s6 }
  0x1d   : > { %p54_p11 = scmp.eq.s32.totalorder %s51_s7, 0  ;;  %p1613_p13 = scmp.lt.s32.totalorder %s1931_s22, 4 }
  0x1e   : > { %p2041_p12 = por %p195_p10, %p69_p5  ;;  %s2047_s9 = sand.u32 1, %s1911_s17  }
  0x1f   : > { %s2050_s10 = scalar_select %p54_p11, %s1911_s17, %s56_s27  }
  0x20   : > { %s2575_s8 = scalar_select %p2041_p12, 1, 0 }
  0x21   : > { %2577 = sst [smem:[#allocation22_spill]] %s2050_s10  ;;  %s2053_s11 = sshll.u32 %s2047_s9, 3 }
  0x22   : > { %2576 = sst [smem:[#allocation21_spill]] %s2575_s8  ;;  %s1385_s12 = sshll.u32 %s1923_s20, 2 }
  0x23   : > { %s1386_s13 = sshll.u32 %s1927_s21, 3  ;;  %p2059_p0 = pnand %p1613_p13, %p2021_p3 }
  0x24   : > { %s2063_s24 = sadd.s32 %s1386_s13, %s1385_s12  ;;  %s238_s28 = sand.u32 1, %s1931_s22  }
  0x25   : > { %s2578_s14 = scalar_select %p2059_p0, 1, 0 }
  0x26   : > { %s2560_s6 = sshll.u32 %s2063_s24, 6  ;;  %s2579_s1 = sld [smem:[#allocation24_spill]] }
  0x27   : > { %s242_s25 = scalar_lea.vmem [#allocation7], %s2053_s11  ;;  %s2077_s29 = scalar_lea.sflag [#allocation8], %s238_s28 }
  0x28   : > { %s255_s10 = sshll.u32 %s242_s25, 4  ;;  %p2082_p2 = pneg %p2059_p0  ;;  %s2075_s10 = int_to_ptr.vmem [resolvable:$true] %s255_s10 }
  0x2c   : > { %s1253_s26 = scalar_lea.hbm %s2579_s1, %s2560_s6  ;;  %s1709_s7 = scalar_lea.hbm %s2579_s1, 1024 }
  0x2d   : > { %s2073_s17 = scalar_lea.hbm %s1253_s26, 128  ;;  %s1734_s12 = scalar_lea.hbm %s1253_s26, 256 }
  0x2e   : > { %p1705_p1 = scmp.ne.s32.totalorder %s2073_s17, %s1734_s12  ;;  %p1710_p5 = scmp.lt.u32.totalorder %s2073_s17, %s2579_s1 }
  0x2f   : > { %p1711_p6 = scmp.lt.u32.totalorder %s1709_s7, %s1734_s12  ;;  %p1713_p10 = scmp.lt.u32.totalorder %s1734_s12, %s2073_s17 }
  0x30   : > { %p1707_p3 = pnand %p2082_p2, %p1705_p1 }
  0x31   : > { %p1712_p7 = por %p1711_p6, %p1710_p5 }
  0x32   : > { %p1708_p4 = pneg %p1707_p3 }
  0x33   : > { %p1714_p11 = por %p1713_p10, %p1712_p7 }
  0x35   : > { %p1715_p13 = pnand %p1714_p11, %p1708_p4 }
  0x37   : > { %1718 = shalt.err (!%p1715_p13)
}
  0x38   : > { %s1719_s26 = scalar_lea.vmem %s2075_s10, 128  ;;  %s1933_s28 = smov [#allocation7]  }
  0x39   : > { %p1720_p1 = scmp.ne.s32.totalorder %s2075_s10, %s1719_s26  ;;  %s1724_s25 = sshll.u32 %s1933_s28, 4  ;;  %s1725_s25 = int_to_ptr.vmem [resolvable:$false] %s1724_s25 }
  0x3a   : > { %s1726_s8 = scalar_lea.vmem %s1725_s25, 256  ;;  %p1727_p9 = scmp.lt.s32.totalorder %s2075_s10, %s1725_s25 }
  0x3b   : > { %p1722_p3 = pnand %p1720_p1, %p2082_p2  ;;  %p1728_p8 = scmp.lt.s32.totalorder %s1726_s8, %s1719_s26 }
  0x3d   : > { %p1723_p12 = pneg %p1722_p3  ;;  %p1729_p5 = por %p1728_p8, %p1727_p9 }
  0x3f   : > { %p1730_p6 = pnand %p1729_p5, %p1723_p12 }
  0x41   : > { %1733 = shalt.err (!%p1730_p6)
}
  0x42   : > { %1602 = dma.hbm_to_vmem [thread:$0]  (!%p2059_p0), %s2073_s17, 128, %s2075_s10, %s2077_s29  }
  0x43   : > { %p1400_p4 = scmp.ge.s32.totalorder %s1931_s22, 1  ;;  %p306_p7 = scmp.lt.s32.totalorder %s1931_s22, 5 }
  0x44   : > { %s2582_s12 = sshll.u32 %s2063_s24, 6  ;;  %s2583_s0 = sld [smem:[#allocation23_spill]] }
  0x45   : > { %p2108_p10 = pnand %p1400_p4, %p306_p7  ;;  %s219_s28 = scalar_lea.vmem [#allocation4], %s2053_s11 }
  0x46   : > { %s231_s25 = sshll.u32 %s219_s28, 4  ;;  %s1393_s17 = sshll.u32 %s1923_s20, 1  ;;  %s2120_s25 = int_to_ptr.vmem [resolvable:$true] %s231_s25 }
  0x47   : > { %s2581_s6 = scalar_select %p2108_p10, 1, 0 }
  0x48   : > { %s216_s10 = scalar_lea.sflag [#allocation5], %s2047_s9 }
  0x4a   : > { %s2117_s26 = scalar_lea.hbm %s2583_s0, %s2582_s12  ;;  %s1740_s12 = scalar_lea.hbm %s2583_s0, 1024 }
  0x4b   : > { %s1735_s8 = scalar_lea.hbm %s2117_s26, 128  ;;  %p1741_p11 = scmp.lt.u32.totalorder %s2117_s26, %s2583_s0 }
  0x4c   : > { %p1736_p8 = scmp.ne.s32.totalorder %s2117_s26, %s1735_s8  ;;  %p1742_p13 = scmp.lt.u32.totalorder %s1740_s12, %s1735_s8 }
  0x4d   : > { %p1744_p3 = scmp.lt.u32.totalorder %s1735_s8, %s2117_s26 }
  0x4e   : > { %p1738_p9 = pnand %p1736_p8, %p2082_p2  ;;  %p1743_p1 = por %p1742_p13, %p1741_p11 }
  0x50   : > { %p1739_p12 = pneg %p1738_p9  ;;  %p1745_p5 = por %p1744_p3, %p1743_p1 }
  0x52   : > { %p1746_p6 = pnand %p1745_p5, %p1739_p12 }
  0x54   : > { %1749 = shalt.err (!%p1746_p6)
}
  0x55   : > { %s1750_s28 = scalar_lea.vmem %s2120_s25, 128  ;;  %s1934_s1 = smov [#allocation4]  }
  0x56   : > { %p1751_p4 = scmp.ne.s32.totalorder %s2120_s25, %s1750_s28  ;;  %s1755_s24 = sshll.u32 %s1934_s1, 4  ;;  %s1756_s24 = int_to_ptr.vmem [resolvable:$false] %s1755_s24 }
  0x57   : > { %s1757_s27 = scalar_lea.vmem %s1756_s24, 256  ;;  %p1758_p9 = scmp.lt.s32.totalorder %s2120_s25, %s1756_s24 }
  0x58   : > { %p1753_p7 = pnand %p1751_p4, %p2082_p2  ;;  %p1759_p10 = scmp.lt.s32.totalorder %s1757_s27, %s1750_s28 }
  0x5a   : > { %p1754_p8 = pneg %p1753_p7  ;;  %p1760_p11 = por %p1759_p10, %p1758_p9 }
  0x5c   : > { %p1761_p13 = pnand %p1760_p11, %p1754_p8 }
  0x5e   : > { %1764 = shalt.err (!%p1761_p13)
}
  0x5f   : > { %1599 = dma.hbm_to_vmem [thread:$0]  (!%p2059_p0), %s2117_s26, 128, %s2120_s25, %s216_s10  }
  0x60   : > { %s1394_s8 = sshll.u32 %s1927_s21, 2  ;;  %s266_s12 = scalar_lea.vmem [#allocation9], %s2053_s11 }
  0x61   : > { %s278_s7 = sshll.u32 %s266_s12, 4  ;;  %s2149_s1 = sadd.s32 %s1394_s8, %s1393_s17  ;;  %s2151_s7 = int_to_ptr.vmem [resolvable:$true] %s278_s7 }
  0x62   : > { %s1395_s28 = sshll.u32 %s2149_s1, 6  ;;  %s1770_s17 = scalar_lea.hbm %s2554_s2, 512 }
  0x63   : > { %s276_s0 = scalar_lea.hbm %s2554_s2, %s1395_s28 }
  0x64   : > { %s1765_s15 = scalar_lea.hbm %s276_s0, 128  ;;  %p1771_p3 = scmp.lt.u32.totalorder %s276_s0, %s2554_s2 }
  0x65   : > { %p1766_p10 = scmp.ne.s32.totalorder %s276_s0, %s1765_s15  ;;  %p1772_p5 = scmp.lt.u32.totalorder %s1770_s17, %s1765_s15 }
  0x66   : > { %p1774_p4 = scmp.lt.u32.totalorder %s1765_s15, %s276_s0 }
  0x67   : > { %p1768_p12 = pnand %p1766_p10, %p2082_p2  ;;  %p1773_p6 = por %p1772_p5, %p1771_p3 }
  0x69   : > { %p1769_p1 = pneg %p1768_p12  ;;  %p1775_p7 = por %p1774_p4, %p1773_p6 }
  0x6b   : > { %p1776_p8 = pnand %p1775_p7, %p1769_p1 }
  0x6d   : > { %1779 = shalt.err (!%p1776_p8)
}
  0x6e   : > { %s1780_s12 = scalar_lea.vmem %s2151_s7, 128  ;;  %s1935_s24 = smov [#allocation9]  }
  0x6f   : > { %p1781_p9 = scmp.ne.s32.totalorder %s2151_s7, %s1780_s12  ;;  %s1785_s27 = sshll.u32 %s1935_s24, 4  ;;  %s1786_s27 = int_to_ptr.vmem [resolvable:$false] %s1785_s27 }
  0x70   : > { %s1787_s26 = scalar_lea.vmem %s1786_s27, 256  ;;  %p1788_p10 = scmp.lt.s32.totalorder %s2151_s7, %s1786_s27 }
  0x71   : > { %p1783_p11 = pnand %p1781_p9, %p2082_p2  ;;  %p1789_p12 = scmp.lt.s32.totalorder %s1787_s26, %s1780_s12 }
  0x73   : > { %p1784_p13 = pneg %p1783_p11  ;;  %p1790_p3 = por %p1789_p12, %p1788_p10 }
  0x75   : > { %p1791_p5 = pnand %p1790_p3, %p1784_p13 }
  0x77   : > { %1794 = shalt.err (!%p1791_p5)
}
  0x78   : > { %1605 = dma.hbm_to_vmem [thread:$0]  (!%p2059_p0), %s276_s0, 128, %s2151_s7, %s2077_s29  }
  0x79   : > { %s2181_s17 = scalar_lea.hbm %s2555_s3, %s1395_s28  ;;  %s289_s10 = scalar_lea.vmem [#allocation10], %s2053_s11 }
  0x7a   : > { %s301_s8 = sshll.u32 %s289_s10, 4  ;;  %s286_s12 = scalar_lea.sflag [#allocation11], %s2047_s9  ;;  %s302_s8 = int_to_ptr.vmem [resolvable:$true] %s301_s8 }
  0x7b   : > { %s1795_s24 = scalar_lea.hbm %s2181_s17, 128  ;;  %s1800_s7 = scalar_lea.hbm %s2555_s3, 512 }
  0x7c   : > { %p1796_p1 = scmp.ne.s32.totalorder %s2181_s17, %s1795_s24  ;;  %p1801_p7 = scmp.lt.u32.totalorder %s2181_s17, %s2555_s3 }
  0x7d   : > { %p1802_p8 = scmp.lt.u32.totalorder %s1800_s7, %s1795_s24  ;;  %p1804_p11 = scmp.lt.u32.totalorder %s1795_s24, %s2181_s17 }
  0x7e   : > { %p1798_p6 = pnand %p1796_p1, %p2082_p2 }
  0x7f   : > { %p1803_p9 = por %p1802_p8, %p1801_p7 }
  0x80   : > { %p1799_p4 = pneg %p1798_p6 }
  0x81   : > { %p1805_p13 = por %p1804_p11, %p1803_p9 }
  0x83   : > { %p1806_p10 = pnand %p1805_p13, %p1799_p4 }
  0x85   : > { %1809 = shalt.err (!%p1806_p10)
}
  0x86   : > { %s1810_s9 = scalar_lea.vmem %s302_s8, 128  ;;  %s1936_s11 = smov [#allocation10]  }
  0x87   : > { %p1811_p12 = scmp.ne.s32.totalorder %s302_s8, %s1810_s9  ;;  %s1815_s27 = sshll.u32 %s1936_s11, 4  ;;  %s1816_s27 = int_to_ptr.vmem [resolvable:$false] %s1815_s27 }
  0x88   : > { %s1817_s26 = scalar_lea.vmem %s1816_s27, 256  ;;  %p1818_p1 = scmp.lt.s32.totalorder %s302_s8, %s1816_s27 }
  0x89   : > { %p1813_p3 = pnand %p1811_p12, %p2082_p2  ;;  %p1819_p6 = scmp.lt.s32.totalorder %s1817_s26, %s1810_s9 }
  0x8b   : > { %p1814_p5 = pneg %p1813_p3  ;;  %p1820_p0 = por %p1819_p6, %p1818_p1 }
  0x8d   : > { %p1821_p7 = pnand %p1820_p0, %p1814_p5 }
  0x8f   : > { %1824 = shalt.err (!%p1821_p7)
}
  0x90   : > { %p2584_p8 = scmp.ne.s32.totalorder %s2578_s14, 0  ;;  %p2585_p4 = scmp.ne.s32.totalorder %s2581_s6, 0 }
  0x91   : > { %s2205_s13 = sand.u32 (!%p2585_p4), 1, %s1907_s16   ;;  %p2586_p0 = scmp.ne.s32.totalorder (!%p2585_p4), %s2573_s30, 0 }
  0x92   : > { %1608 = dma.hbm_to_vmem [thread:$0]  (!%p2584_p8), %s2181_s17, 128, %s302_s8, %s286_s12  }
  0x93   : > { %310 = sbr.rel (%p2585_p4) target bundleno = 785 (0x311), region = 36  ;;  %s2208_s15 = sshll.u32 (!%p2585_p4), %s2205_s13, 3 }
  0x94   : > { %s313_s25 = scalar_lea.sflag (!%p2585_p4), [#allocation5], %s2205_s13  ;;  %s316_s10 = scalar_lea.vmem (!%p2585_p4), [#allocation4], %s2208_s15 }
  0x9a   : > { %1886 = dma.done.wait (%p2586_p0), %s313_s25, 128  }
  0x9b   : > { %1888 = vsyncadd (%p2586_p0), %s313_s25, 4294967168  ;;  %s321_s14 = sand.u32 1, %s2007_s23   ;;  %s325_s17 = scalar_lea.vmem [#allocation7], %s2208_s15 }
  0x9c   : > { %s322_s6 = scalar_lea.sflag [#allocation8], %s321_s14 }
  0x9d   : > { %1890 = dma.done.wait (%p2586_p0), %s322_s6, 256  }
  0x9e   : > { %1892 = vsyncadd (%p2586_p0), %s322_s6, 4294967040  ;;  %s334_s8 = scalar_lea.vmem [#allocation9], %s2208_s15  ;;  %s340_s12 = scalar_lea.sflag [#allocation11], %s2205_s13 }
  0x9f   : > { %s343_s24 = scalar_lea.vmem [#allocation10], %s2208_s15 }
  0xa0   : > { %1894 = dma.done.wait (%p2586_p0), %s340_s12, 128  }
  0xa1   : > { %1896 = vsyncadd (%p2586_p0), %s340_s12, 4294967168  ;;  %s2230_s23 = scalar_lea.vmem [#allocation12], %s2208_s15  ;;  %p1406_p2 = scmp.ne.s32.totalorder %s1915_s18, 0 }
  0xa2   : > { %v1937_v0 = vmov (!%p1406_p2), 0.0  }
  0xa3   : > { %393 = sbr.rel (%p1406_p2) target bundleno = 180 (0xb4), region = 56  ;;  %394 = vst [vmem:[#allocation2] sm:$0xff] (!%p1406_p2), %v1937_v0  ;;  %395 = vst [vmem:[#allocation2 + $0x8] sm:$0xff] (!%p1406_p2), %v1937_v0 }
  0xa4   : > { %396 = vst [vmem:[#allocation2 + $0x10] sm:$0xff] (!%p1406_p2), %v1937_v0  ;;  %397 = vst [vmem:[#allocation2 + $0x18] sm:$0xff] (!%p1406_p2), %v1937_v0 }
  0xa5   : > { %398 = vst [vmem:[#allocation2 + $0x20] sm:$0xff] (!%p1406_p2), %v1937_v0  ;;  %399 = vst [vmem:[#allocation2 + $0x28] sm:$0xff] (!%p1406_p2), %v1937_v0 }
  0xa6   : > { %400 = vst [vmem:[#allocation2 + $0x30] sm:$0xff] (!%p1406_p2), %v1937_v0  ;;  %401 = vst [vmem:[#allocation2 + $0x38] sm:$0xff] (!%p1406_p2), %v1937_v0 }
  0xa7   : > { %402 = vst [vmem:[#allocation2 + $0x40] sm:$0xff] (!%p1406_p2), %v1937_v0  ;;  %403 = vst [vmem:[#allocation2 + $0x48] sm:$0xff] (!%p1406_p2), %v1937_v0 }
  0xa8   : > { %404 = vst [vmem:[#allocation2 + $0x50] sm:$0xff] (!%p1406_p2), %v1937_v0  ;;  %405 = vst [vmem:[#allocation2 + $0x58] sm:$0xff] (!%p1406_p2), %v1937_v0 }
  0xa9   : > { %406 = vst [vmem:[#allocation2 + $0x60] sm:$0xff] (!%p1406_p2), %v1937_v0  ;;  %407 = vst [vmem:[#allocation2 + $0x68] sm:$0xff] (!%p1406_p2), %v1937_v0 }
  0xaa   : > { %408 = vst [vmem:[#allocation2 + $0x70] sm:$0xff] %v1937_v0  ;;  %409 = vst [vmem:[#allocation2 + $0x78] sm:$0xff] %v1937_v0 }
  0xab   : > { %410 = vst [vmem:[#allocation2 + $0x80] sm:$0xff] %v1937_v0  ;;  %411 = vst [vmem:[#allocation2 + $0x88] sm:$0xff] %v1937_v0 }
  0xac   : > { %412 = vst [vmem:[#allocation2 + $0x90] sm:$0xff] %v1937_v0  ;;  %413 = vst [vmem:[#allocation2 + $0x98] sm:$0xff] %v1937_v0 }
  0xad   : > { %414 = vst [vmem:[#allocation2 + $0xa0] sm:$0xff] %v1937_v0  ;;  %415 = vst [vmem:[#allocation2 + $0xa8] sm:$0xff] %v1937_v0 }
  0xae   : > { %416 = vst [vmem:[#allocation2 + $0xb0] sm:$0xff] %v1937_v0  ;;  %417 = vst [vmem:[#allocation2 + $0xb8] sm:$0xff] %v1937_v0 }
  0xaf   : > { %418 = vst [vmem:[#allocation2 + $0xc0] sm:$0xff] %v1937_v0  ;;  %419 = vst [vmem:[#allocation2 + $0xc8] sm:$0xff] %v1937_v0 }
  0xb0   : > { %420 = vst [vmem:[#allocation2 + $0xd0] sm:$0xff] %v1937_v0  ;;  %421 = vst [vmem:[#allocation2 + $0xd8] sm:$0xff] %v1937_v0 }
  0xb1   : > { %422 = vst [vmem:[#allocation2 + $0xe0] sm:$0xff] %v1937_v0  ;;  %423 = vst [vmem:[#allocation2 + $0xe8] sm:$0xff] %v1937_v0 }
  0xb2   : > { %424 = vst [vmem:[#allocation2 + $0xf0] sm:$0xff] %v1937_v0  ;;  %425 = vst [vmem:[#allocation2 + $0xf8] sm:$0xff] %v1937_v0 }
  0xb3   : > { %426 = vst [vmem:[#allocation3] sm:$0x1] %v1937_v0  ;;  %427 = vst [vmem:[#allocation3 + $0x1] sm:$0x1] %v1937_v0 }
  0xb4 PF: > { %v431_v1 = vld [vmem:[%s325_s17] sm:$0xff]  ;;  %v2237_v2 = vld [vmem:[%s316_s10] sm:$0xff]  ;;  %v1938_v4 = vmov 0.0   ;;  %vm1939_vm0 = vmmov 0   ;;  %vm575_vm3 = vcmask 1043456   ;;  %v459_v52 = vlaneseq  ;;  %s1427_s30 = sshll.u32 %s1915_s18, 1 }
  0xb5   : > { %v432_v3 = vunpack.c.l.bf16 %v431_v1  ;;  %1476 = vmatprep.subr.bf16.mxu0 %v1938_v4  ;;  %1478 = vmatprep.mubr.msk.bf16.mxu0 %vm1939_vm0, %v1938_v4  ;;  %v429_v5 = vunpack.c.l.bf16 %v2237_v2  ;;  %v2252_v14 = vld [vmem:[%s334_s8] sm:$0xff]  ;;  %v433_v16 = vunpack.c.h.bf16 %v431_v1  ;;  %v2271_v24 = vld [vmem:[#allocation2 + $0x18] sm:$0xff]  ;;  %vm571_vm5 = vcmask 64512   ;;  %s1428_s0 = sshll.u32 %s1919_s19, 2  ;;  %s1204_s1 = sshll.u32 %s2230_s23, 4  ;;  %s2499_s1 = int_to_ptr.vmem [resolvable:$true] %s1204_s1 }
  0xb6   : > { %1482 = vmatprep.subr.bf16.mxu1 %v1938_v4  ;;  %1498 = vmatprep.mubr.msk.bf16.mxu1 %vm1939_vm0, %v1938_v4  ;;  %v577_v18 = vsel %vm575_vm3, %v2252_v14, 0  ;;  %v2263_v20 = vld [vmem:[#allocation2] sm:$0xff]  ;;  %v2265_v21 = vld [vmem:[#allocation2 + $0x8] sm:$0xff]  ;;  %v2267_v22 = vld [vmem:[#allocation2 + $0x10] sm:$0xff]  ;;  %v2328_v54 = vshrl.u32 %v459_v52, 7  ;;  %v1416_v62 = vcombine.high %v2252_v14, %v2252_v14  ;;  %v430_v1 = vunpack.c.h.bf16 %v2237_v2  ;;  %s1200_s29 = sadd.s32 %s1428_s0, %s1427_s30  ;;  %s1186_s19 = scalar_lea.sflag [#allocation6], %s2205_s13 }
  0xb7   : > { %v448_v6 = vmul.f32 1.442695, %v432_v3  ;;  %v438_v7 = vmul.f32 1.442695, %v429_v5  ;;  %v446_v8 = vadd.f32 1.0, %v432_v3  ;;  %vm444_vm1 = vcmp.gt.f32.partialorder %v432_v3, 0.0 }
  0xb8   : > { %v436_v10 = vadd.f32 1.0, %v429_v5  ;;  %vm434_vm2 = vcmp.gt.f32.partialorder %v429_v5, 0.0  ;;  %v450_v19 = vmul.f32 1.442695, %v433_v16  ;;  %v523_v23 = vpack.c.bf16 %v2265_v21, %v2263_v20  ;;  %v2276_v26 = vld [vmem:[#allocation2 + $0x20] sm:$0xff]  ;;  %v2278_v27 = vld [vmem:[#allocation2 + $0x28] sm:$0xff] }
  0xb9   : > { %1684 = vpow2.f32 %v448_v6  ;;  %v524_v25 = vpack.c.bf16 %v2271_v24, %v2267_v22  ;;  %v525_v28 = vpack.c.bf16 %v2278_v27, %v2276_v26  ;;  %v2283_v29 = vld [vmem:[#allocation2 + $0x30] sm:$0xff]  ;;  %v2285_v30 = vld [vmem:[#allocation2 + $0x38] sm:$0xff]  ;;  %v447_v31 = vadd.f32 1.0, %v433_v16  ;;  %v2290_v34 = vld [vmem:[#allocation2 + $0x40] sm:$0xff]  ;;  %s1429_s7 = sshll.u32 %s1200_s29, 6  ;;  %s1825_s11 = scalar_lea.vmem %s2499_s1, 128 }
  0xba   : > { %1686 = vpow2.f32 %v438_v7  ;;  %1483 = vmatpush3.bf16.msra.mxu1 %v523_v23  ;;  %vm445_vm4 = vcmp.gt.f32.partialorder %v433_v16, 0.0  ;;  %v526_v33 = vpack.c.bf16 %v2285_v30, %v2283_v29  ;;  %v2292_v35 = vld [vmem:[#allocation2 + $0x48] sm:$0xff]  ;;  %v2301_v39 = vld [vmem:[#allocation2 + $0x50] sm:$0xff]  ;;  %v2303_v40 = vld [vmem:[#allocation2 + $0x58] sm:$0xff]  ;;  %v625_v56 = vsub.s32 0, %v2328_v54  ;;  %s2497_s18 = scalar_lea.hbm %s2556_s4, %s1429_s7  ;;  %p1826_p9 = scmp.ne.s32.totalorder %s2499_s1, %s1825_s11 }
  0xbb   : > { %1688 = vpow2.f32 %v450_v19  ;;  %1484 = vmatprep.subr.bf16.mxu1 %v1938_v4  ;;  %v527_v37 = vpack.c.bf16 %v2292_v35, %v2290_v34  ;;  %v528_v41 = vpack.c.bf16 %v2303_v40, %v2301_v39  ;;  %v2308_v42 = vld [vmem:[#allocation2 + $0x60] sm:$0xff]  ;;  %v2310_v43 = vld [vmem:[#allocation2 + $0x68] sm:$0xff]  ;;  %v2315_v45 = vld [vmem:[#allocation2 + $0x70] sm:$0xff]  ;;  %v440_v5 = vmul.f32 1.442695, %v430_v1  ;;  %p2587_p11 = scmp.ne.s32.totalorder %s2574_s5, 0 }
  0xbc   : > { %v529_v44 = vpack.c.bf16 %v2310_v43, %v2308_v42  ;;  %v2317_v46 = vld [vmem:[#allocation2 + $0x78] sm:$0xff]  ;;  %v480_v55 = vld [vmem:[#allocation3] sm:$0x1]  ;;  %vm435_vm6 = vcmp.gt.f32.partialorder %v430_v1, 0.0  ;;  %s1940_s27 = smov [#allocation12]  }
  0xbd   : > { %v530_v47 = vpack.c.bf16 %v2317_v46, %v2315_v45  ;;  %v626_v58 = vrot.slane %v480_v55, %v625_v56  ;;  %1690 = vpow2.f32 %v440_v5  ;;  %v2368_v23 = vld [vmem:[#allocation2 + $0x80] sm:$0xff]  ;;  %p1827_p13 = pnand %p1826_p9, %p2587_p11  ;;  %s1829_s26 = sshll.u32 %s1940_s27, 4  ;;  %s1830_s26 = int_to_ptr.vmem [resolvable:$false] %s1829_s26 }
  0xbe   : > { %1485 = vmatpush3.bf16.msra.mxu1 %v524_v25  ;;  %v2370_v25 = vld [vmem:[#allocation2 + $0x88] sm:$0xff]  ;;  %s1831_s15 = scalar_lea.vmem %s1830_s26, 256  ;;  %p1832_p12 = scmp.lt.s32.totalorder %s2499_s1, %s1830_s26 }
  0xbf   : > { %1486 = vmatprep.subr.bf16.mxu1 %v1938_v4  ;;  %p1828_p10 = pneg %p1827_p13  ;;  %p1833_p3 = scmp.lt.s32.totalorder %s1831_s15, %s1825_s11 }
  0xc1   : > { %p1834_p5 = por %p1833_p3, %p1832_p12 }
  0xc2   : > { %1487 = vmatpush3.bf16.msra.mxu1 %v525_v28 }
  0xc3   : > { %v1685_v9 = vpop.eup %1684  ;;  %1488 = vmatprep.subr.bf16.mxu1 %v1938_v4  ;;  %p1835_p1 = pnand %p1834_p5, %p1828_p10 }
  0xc4   : > { %v2246_v11 = vsel %vm444_vm1, %v446_v8, %v1685_v9  ;;  %v1687_v12 = vpop.eup %1686  ;;  %v437_v9 = vadd.f32 1.0, %v430_v1  ;;  %v2407_v1 = vld [vmem:[#allocation2 + $0xc0] sm:$0xff] }
  0xc5   : > { %v456_v13 = vpack.c.bf16 %v2246_v11, %v2246_v11  ;;  %v2254_v15 = vsel %vm434_vm2, %v436_v10, %v1687_v12  ;;  %v1689_v32 = vpop.eup %1688  ;;  %v815_v48 = vrot.slane %v2246_v11, 4 }
  0xc6   : > { %v454_v17 = vpack.c.bf16 %v2254_v15, %v2254_v15  ;;  %v2294_v36 = vsel %vm445_vm4, %v447_v31, %v1689_v32  ;;  %1489 = vmatpush3.bf16.msra.mxu1 %v526_v33  ;;  %v628_v60 = vmul.f32 %v626_v58, %v2254_v15 }
  0xc7   : > { %646 = vxpose.xlu0.c.b16.start.end [1/1] (short) %v456_v13, 128  ;;  %1477 = vmatpush3.bf16.xpose.msra.mxu0 %v456_v13  ;;  %v457_v38 = vpack.c.bf16 %v2294_v36, %v2294_v36  ;;  %v816_v49 = vadd.f32 %v815_v48, %v2246_v11  ;;  %v1691_v10 = vpop.eup %1690  ;;  %v1177_v31 = vrot.slane %v2294_v36, 4  ;;  %v2380_v48 = vld [vmem:[#allocation2 + $0x90] sm:$0xff] }
  0xc8   : > { %1584 = vmatprep.subr.msk.bf16.mxu0 %vm575_vm3, %v2252_v14  ;;  %1490 = vmatprep.subr.bf16.mxu1 %v1938_v4  ;;  %v2348_v11 = vsel %vm435_vm6, %v437_v9, %v1691_v10  ;;  %v2356_v14 = vsel %vm575_vm3, %v1416_v62, 0  ;;  %v2417_v9 = vld [vmem:[#allocation2 + $0xd0] sm:$0xff]  ;;  %v2419_v10 = vld [vmem:[#allocation2 + $0xd8] sm:$0xff] }
  0xc9   : > { %v817_v50 = vrot.slane %v816_v49, 2  ;;  %629 = vadd.xlane.f32.xlu1 %v628_v60  ;;  %v2352_v12 = vpack.c.bf16 %v2348_v11, %v2348_v11  ;;  %v2400_v60 = vld [vmem:[#allocation2 + $0xb0] sm:$0xff] }
  0xca   : > { %1491 = vmatpush3.bf16.msra.mxu1 %v527_v37 }
  0xcb   : > { %1492 = vmatprep.subr.bf16.mxu1 %v1938_v4  ;;  %v818_v51 = vadd.f32 %v817_v50, %v816_v49  ;;  %v2382_v49 = vld [vmem:[#allocation2 + $0x98] sm:$0xff] }
  0xcd   : > { %v819_v53 = vrot.slane %v818_v51, 1 }
  0xce   : > { %1479 = vmatmul.mubr.bf16.vlgmr.msra.gmra.mrb[0].mxu0 %v454_v17  ;;  %1493 = vmatpush3.bf16.msra.mxu1 %v528_v41 }
  0xcf   : > { %1509 = vmatpush3.bf16.msra.mxu0 %v577_v18  ;;  %1494 = vmatprep.subr.bf16.mxu1 %v1938_v4  ;;  %v820_v57 = vadd.f32 %v819_v53, %v818_v51  ;;  %v885_v53 = vpack.c.bf16 %v2382_v49, %v2380_v48 }
  0xd0   : > { %1526 = vmatprep.subr.bf16.mxu0 %v1938_v4 }
  0xd1   : > { %v821_v59 = vadd.f32 %v820_v57, %v480_v55  ;;  %v2392_v55 = vld [vmem:[#allocation2 + $0xa0] sm:$0xff]  ;;  %v2394_v57 = vld [vmem:[#allocation2 + $0xa8] sm:$0xff] }
  0xd2   : > { %1495 = vmatpush3.bf16.msra.mxu1 %v529_v44 }
  0xd3   : > { %1496 = vmatprep.subr.bf16.mxu1 %v1938_v4  ;;  %822 = vst [vmem:[#allocation3] sm:$0x1] %v821_v59 }
  0xd6   : > { %1497 = vmatpush3.bf16.msra.mxu1 %v530_v47 }
  0xd7   : > { %1502 = vmatprep.subr.bf16.mxu1 %v1938_v4 }
  0xd9   : > { %1499 = vmatmul.mubr.bf16.vlgmr.msra.gmra.mrb[0].mxu1 %v454_v17 }
  0xda   : > { %1503 = vmatpush3.bf16.msra.mxu1 %v577_v18  ;;  %1504 = vmatprep.mubr.msk.bf16.mxu1 %vm1939_vm0, %v1938_v4  ;;  %v2363_v18 = vand.u32 127, %v459_v52  ;;  %v1178_v52 = vadd.f32 %v1177_v31, %v2294_v36  ;;  %v886_v36 = vpack.c.bf16 %v2394_v57, %v2392_v55 }
  0xdb   : > { %1532 = vmatprep.subr.bf16.mxu1 %v1938_v4 }
  0xdc   : > { %vm463_vm7 = vcmp.le.s32.totalorder %v2363_v18, %v2328_v54  ;;  %v1179_v59 = vrot.slane %v1178_v52, 2 }
  0xe4   : > { %1008 = vxpose.xlu0.c.b16.start.end [1/1] (short) %v457_v38, 128 }
 0x12d   : > { %v654_v61 = vpop.trf.xlu0 }
 0x12e   : > { %1510 = vmatprep.mubr.msk.bf16.mxu0 %vm571_vm5, %v654_v61  ;;  %v2402_v61 = vld [vmem:[#allocation2 + $0xb8] sm:$0xff] }
 0x131   : > { %v655_v63 = vpop.trf.xlu0 }
 0x132   : > { %1511 = vmatmul.mubr.msk.bf16.vlgmr.msra.gmra.mrb[4].mxu0 %vm571_vm5, %v655_v63 }
 0x133   : > { %1527 = vmatpush3.bf16.xpose.msra.mxu0 %v457_v38  ;;  %v884_v38 = vpack.c.bf16 %v2370_v25, %v2368_v23 }
 0x134   : > { %1585 = vmatprep.subr.msk.bf16.mxu0 %vm575_vm3, %v1416_v62  ;;  %v1180_v62 = vadd.f32 %v1179_v59, %v1178_v52 }
 0x135   : > { %v656_v0 = vpop.trf.xlu0 }
 0x136   : > { %1514 = vmatprep.mubr.msk.bf16.mxu0 %vm571_vm5, %v656_v0  ;;  %v1181_v63 = vrot.slane %v1180_v62, 1  ;;  %v887_v0 = vpack.c.bf16 %v2402_v61, %v2400_v60 }
 0x138   : > { %v1182_v5 = vadd.f32 %v1181_v63, %v1180_v62 }
 0x139   : > { %v657_v3 = vpop.trf.xlu0 }
 0x13a   : > { %1515 = vmatmul.mubr.msk.bf16.gmra.mrb[8].mxu0 %vm571_vm5, %v657_v3  ;;  %v2409_v3 = vld [vmem:[#allocation2 + $0xc8] sm:$0xff] }
 0x13d   : > { %v658_v6 = vpop.trf.xlu0 }
 0x13e   : > { %1518 = vmatprep.mubr.msk.bf16.mxu0 %vm571_vm5, %v658_v6  ;;  %v2411_v6 = vld [vmem:[#allocation3 + $0x1] sm:$0x1] }
 0x141   : > { %v659_v7 = vpop.trf.xlu0 }
 0x142   : > { %1519 = vmatmul.mubr.msk.bf16.gmra.mrb[12].mxu0 %vm571_vm5, %v659_v7  ;;  %v1183_v7 = vadd.f32 %v1182_v5, %v2411_v6 }
 0x144   : > { %1184 = vst [vmem:[#allocation3 + $0x1] sm:$0x1] %v1183_v7 }
 0x145   : > { %v660_v8 = vpop.trf.xlu0 }
 0x146   : > { %1522 = vmatprep.mubr.msk.bf16.mxu0 %vm571_vm5, %v660_v8  ;;  %v888_v8 = vpack.c.bf16 %v2409_v3, %v2407_v1 }
 0x149   : > { %v661_v2 = vpop.trf.xlu0 }
 0x14a   : > { %1523 = vmatmul.mubr.msk.bf16.gmra.mrb[16].mxu0 %vm571_vm5, %v661_v2  ;;  %v889_v2 = vpack.c.bf16 %v2419_v10, %v2417_v9 }
 0x14b   : > { %1528 = vmatprep.mubr.msk.bf16.mxu0 %vm1939_vm0, %v1938_v4 }
 0x14d   : > { %v1016_v13 = vpop.trf.xlu0 }
 0x151   : > { %v1017_v15 = vpop.trf.xlu0 }
 0x152   : > { %1529 = vmatmul.mubr.bf16.vlgmr.msra.gmra.mrb[20].mxu0 %v2352_v12 }
 0x153   : > { %1559 = vmatpush3.bf16.msra.mxu0 %v2356_v14  ;;  %1560 = vmatprep.mubr.msk.bf16.mxu0 %vm571_vm5, %v1016_v13  ;;  %v2424_v13 = vld [vmem:[#allocation2 + $0xe0] sm:$0xff] }
 0x155   : > { %v1018_v16 = vpop.trf.xlu0 }
 0x156   : > { %v630_v18 = vpop.xlane.xlu1 %629 }
 0x159   : > { %v1019_v17 = vpop.trf.xlu0 }
 0x15a   : > { %1561 = vmatmul.mubr.msk.bf16.vlgmr.msra.gmra.mrb[24].mxu0 %vm571_vm5, %v1017_v15  ;;  %v2426_v15 = vld [vmem:[#allocation2 + $0xe8] sm:$0xff] }
 0x15b   : > { %1564 = vmatprep.mubr.msk.bf16.mxu0 %vm571_vm5, %v1018_v16  ;;  %v890_v16 = vpack.c.bf16 %v2426_v15, %v2424_v13 }
 0x15d   : > { %v1020_v19 = vpop.trf.xlu0 }
 0x161   : > { %v1021_v28 = vpop.trf.xlu0 }
 0x162   : > { %1565 = vmatmul.mubr.msk.bf16.gmra.mrb[28].mxu0 %vm571_vm5, %v1019_v17  ;;  %v2431_v17 = vld [vmem:[#allocation2 + $0xf0] sm:$0xff] }
 0x163   : > { %1568 = vmatprep.mubr.msk.bf16.mxu0 %vm571_vm5, %v1020_v19  ;;  %v2433_v19 = vld [vmem:[#allocation2 + $0xf8] sm:$0xff] }
 0x165   : > { %v1022_v50 = vpop.trf.xlu0 }
 0x169   : > { %v1023_v58 = vpop.trf.xlu0 }
 0x16a   : > { %1569 = vmatmul.mubr.msk.bf16.gmra.mrb[32].mxu0 %vm571_vm5, %v1021_v28  ;;  %v891_v28 = vpack.c.bf16 %v2433_v19, %v2431_v17 }
 0x16b   : > { %1572 = vmatprep.mubr.msk.bf16.mxu0 %vm571_vm5, %v1022_v50 }
 0x172   : > { %1573 = vmatmul.mubr.msk.bf16.gmra.mrb[36].mxu0 %vm571_vm5, %v1023_v58 }
 0x1a1   : > { %v515_v32 = vpop.f32.mrb[0].mxu0 }
 0x1a2   : > { %v521_v33 = vsel %vm463_vm7, %v515_v32, 0.0  ;;  %v1480_v37 = vpop.f32.mrb[1].mxu0 }
 0x1a3   : > { %v522_v41 = vpack.c.bf16 %v521_v33, %v521_v33  ;;  %v518_v44 = vpop.f32.mrb[2].mxu0  ;;  %v619_v47 = vsel %vm571_vm5, %v521_v33, 0.0 }
 0x1a4   : > { %v1481_v51 = vpop.f32.mrb[3].mxu0  ;;  %620 = vadd.xlane.f32.xlu1 %v619_v47 }
 0x1a5   : > { %1505 = vmatmul.mubr.msk.bf16.vlgmr.msra.gmra.mrb[0].mxu1 %vm571_vm5, %v522_v41 }
 0x1a6   : > { %1533 = vmatpush3.bf16.msra.mxu1 %v884_v38  ;;  %1548 = vmatprep.mubr.msk.bf16.mxu1 %vm1939_vm0, %v1938_v4 }
 0x1a7   : > { %1534 = vmatprep.subr.bf16.mxu1 %v1938_v4 }
 0x1aa   : > { %1535 = vmatpush3.bf16.msra.mxu1 %v885_v53 }
 0x1ab   : > { %1536 = vmatprep.subr.bf16.mxu1 %v1938_v4 }
 0x1ae   : > { %1537 = vmatpush3.bf16.msra.mxu1 %v886_v36 }
 0x1af   : > { %1538 = vmatprep.subr.bf16.mxu1 %v1938_v4 }
 0x1b2   : > { %1539 = vmatpush3.bf16.msra.mxu1 %v887_v0 }
 0x1b3   : > { %1540 = vmatprep.subr.bf16.mxu1 %v1938_v4 }
 0x1b6   : > { %1541 = vmatpush3.bf16.msra.mxu1 %v888_v8 }
 0x1b7   : > { %1542 = vmatprep.subr.bf16.mxu1 %v1938_v4 }
 0x1ba   : > { %1543 = vmatpush3.bf16.msra.mxu1 %v889_v2 }
 0x1bb   : > { %1544 = vmatprep.subr.bf16.mxu1 %v1938_v4 }
 0x1be   : > { %1545 = vmatpush3.bf16.msra.mxu1 %v890_v16  ;;  %v2470_v16 = vld [vmem:[%s343_s24] sm:$0xff]  }
 0x1bf   : > { %1546 = vmatprep.subr.bf16.mxu1 %v1938_v4 }
 0x1c2   : > { %1547 = vmatpush3.bf16.msra.mxu1 %v891_v28 }
 0x1c3   : > { %1552 = vmatprep.subr.bf16.mxu1 %v1938_v4 }
 0x1c5   : > { %1549 = vmatmul.mubr.bf16.vlgmr.msra.gmra.mrb[4].mxu1 %v2352_v12 }
 0x1c6   : > { %1553 = vmatpush3.bf16.msra.mxu1 %v2356_v14  ;;  %1554 = vmatprep.mubr.msk.bf16.mxu1 %vm1939_vm0, %v1938_v4 }
 0x205   : > { %v1512_v31 = vpop.f32.mrb[4].mxu0 }
 0x206   : > { %v785_v32 = vadd.f32 %v1512_v31, %v2267_v22  ;;  %v720_v33 = vpop.f32.mrb[5].mxu0 }
 0x207   : > { %v783_v37 = vadd.f32 %v720_v33, %v2263_v20  ;;  %v1513_v38 = vpop.f32.mrb[6].mxu0 }
 0x208   : > { %801 = vst [vmem:[#allocation2 + $0x10] sm:$0xff] %v785_v32  ;;  %v786_v41 = vadd.f32 %v1513_v38, %v2271_v24  ;;  %v723_v44 = vpop.f32.mrb[7].mxu0 }
 0x209   : > { %799 = vst [vmem:[#allocation2] sm:$0xff] %v783_v37  ;;  %v784_v47 = vadd.f32 %v723_v44, %v2265_v21 }
 0x20a   : > { %802 = vst [vmem:[#allocation2 + $0x18] sm:$0xff] %v786_v41 }
 0x20b   : > { %800 = vst [vmem:[#allocation2 + $0x8] sm:$0xff] %v784_v47 }
 0x20d   : > { %v1516_v12 = vpop.f32.mrb[8].mxu0 }
 0x20e   : > { %v789_v14 = vadd.f32 %v1516_v12, %v2283_v29  ;;  %v736_v4 = vpop.f32.mrb[9].mxu0 }
 0x20f   : > { %v787_v50 = vadd.f32 %v736_v4, %v2276_v26  ;;  %v1517_v22 = vpop.f32.mrb[10].mxu0 }
 0x210   : > { %805 = vst [vmem:[#allocation2 + $0x30] sm:$0xff] %v789_v14  ;;  %v790_v20 = vadd.f32 %v1517_v22, %v2285_v30  ;;  %v739_v51 = vpop.f32.mrb[11].mxu0 }
 0x211   : > { %803 = vst [vmem:[#allocation2 + $0x20] sm:$0xff] %v787_v50  ;;  %v788_v24 = vadd.f32 %v739_v51, %v2278_v27 }
 0x212   : > { %806 = vst [vmem:[#allocation2 + $0x38] sm:$0xff] %v790_v20 }
 0x213   : > { %804 = vst [vmem:[#allocation2 + $0x28] sm:$0xff] %v788_v24 }
 0x215   : > { %v1520_v52 = vpop.f32.mrb[12].mxu0 }
 0x216   : > { %v793_v21 = vadd.f32 %v1520_v52, %v2301_v39  ;;  %v752_v53 = vpop.f32.mrb[13].mxu0 }
 0x217   : > { %v791_v58 = vadd.f32 %v752_v53, %v2290_v34  ;;  %v1521_v29 = vpop.f32.mrb[14].mxu0 }
 0x218   : > { %809 = vst [vmem:[#allocation2 + $0x50] sm:$0xff] %v793_v21  ;;  %v794_v26 = vadd.f32 %v1521_v29, %v2303_v40  ;;  %v755_v59 = vpop.f32.mrb[15].mxu0 }
 0x219   : > { %807 = vst [vmem:[#allocation2 + $0x40] sm:$0xff] %v791_v58  ;;  %v792_v30 = vadd.f32 %v755_v59, %v2292_v35  ;;  %v988_v35 = vrot.slane %v2411_v6, %v625_v56  ;;  %v635_v56 = vunpack.c.l.bf16 %v2470_v16 }
 0x21a   : > { %810 = vst [vmem:[#allocation2 + $0x58] sm:$0xff] %v794_v26 }
 0x21b   : > { %808 = vst [vmem:[#allocation2 + $0x48] sm:$0xff] %v792_v30  ;;  %v636_v6 = vsub.f32 0.0, %v635_v56 }
 0x21d   : > { %v1524_v36 = vpop.f32.mrb[16].mxu0  ;;  %v637_v54 = vmul.f32 1.442695, %v636_v6 }
 0x21e   : > { %v797_v27 = vadd.f32 %v1524_v36, %v2315_v45  ;;  %v768_v62 = vpop.f32.mrb[17].mxu0 }
 0x21f   : > { %v795_v63 = vadd.f32 %v768_v62, %v2308_v42  ;;  %v1525_v39 = vpop.f32.mrb[18].mxu0  ;;  %1692 = vpow2.f32 %v637_v54 }
 0x220   : > { %813 = vst [vmem:[#allocation2 + $0x70] sm:$0xff] %v797_v27  ;;  %v798_v34 = vadd.f32 %v1525_v39, %v2317_v46  ;;  %v771_v0 = vpop.f32.mrb[19].mxu0 }
 0x221   : > { %811 = vst [vmem:[#allocation2 + $0x60] sm:$0xff] %v795_v63  ;;  %v796_v40 = vadd.f32 %v771_v0, %v2310_v43  ;;  %v990_v43 = vmul.f32 %v988_v35, %v2348_v11  ;;  %v997_v35 = vunpack.c.h.bf16 %v2470_v16 }
 0x222   : > { %814 = vst [vmem:[#allocation2 + $0x78] sm:$0xff] %v798_v34 }
 0x223   : > { %812 = vst [vmem:[#allocation2 + $0x68] sm:$0xff] %v796_v40 }
 0x225   : > { %v876_v5 = vpop.f32.mrb[20].mxu0 }
 0x226   : > { %v882_v42 = vsel %vm463_vm7, %v876_v5, 0.0  ;;  %v1530_v45 = vpop.f32.mrb[21].mxu0 }
 0x227   : > { %v883_v7 = vpack.c.bf16 %v882_v42, %v882_v42  ;;  %v879_v8 = vpop.f32.mrb[22].mxu0  ;;  %v981_v46 = vsel %vm571_vm5, %v882_v42, 0.0 }
 0x228   : > { %982 = vadd.xlane.f32.xlu1 %v981_v46  ;;  %v1531_v2 = vpop.f32.mrb[23].mxu0 }
 0x229   : > { %1555 = vmatmul.mubr.msk.bf16.vlgmr.msra.gmra.mrb[4].mxu1 %vm571_vm5, %v883_v7  ;;  %v1693_v28 = vpop.eup %1692 }
 0x22a   : > { %v639_v41 = vadd.f32 1.0, %v1693_v28 }
 0x22c   : > { %991 = vadd.xlane.f32.xlu1 %v990_v43  ;;  %1694 = vrcp.f32 %v639_v41 }
 0x22d   : > { %v1562_v31 = vpop.f32.mrb[24].mxu0 }
 0x22e   : > { %v1147_v32 = vadd.f32 %v1562_v31, %v2380_v48  ;;  %v1082_v33 = vpop.f32.mrb[25].mxu0 }
 0x22f   : > { %v1145_v11 = vadd.f32 %v1082_v33, %v2368_v23  ;;  %v1563_v38 = vpop.f32.mrb[26].mxu0 }
 0x230   : > { %1163 = vst [vmem:[#allocation2 + $0x90] sm:$0xff] %v1147_v32  ;;  %v1148_v44 = vadd.f32 %v1563_v38, %v2382_v49  ;;  %v1085_v47 = vpop.f32.mrb[27].mxu0 }
 0x231   : > { %v621_v37 = vpop.xlane.xlu1 %620  ;;  %1161 = vst [vmem:[#allocation2 + $0x80] sm:$0xff] %v1145_v11  ;;  %v1146_v12 = vadd.f32 %v1085_v47, %v2370_v25 }
 0x232   : > { %v631_v14 = vadd.f32 %v630_v18, %v621_v37  ;;  %1164 = vst [vmem:[#allocation2 + $0x98] sm:$0xff] %v1148_v44 }
 0x233   : > { %1162 = vst [vmem:[#allocation2 + $0x88] sm:$0xff] %v1146_v12 }
 0x234   : > { %1696 = vrcp.f32 %v631_v14 }
 0x235   : > { %v1566_v4 = vpop.f32.mrb[28].mxu0 }
 0x236   : > { %v1151_v48 = vadd.f32 %v1566_v4, %v2400_v60  ;;  %v1098_v50 = vpop.f32.mrb[29].mxu0  ;;  %v1695_v24 = vpop.eup %1694 }
 0x237   : > { %v1149_v23 = vadd.f32 %v1098_v50, %v2392_v55  ;;  %v1567_v22 = vpop.f32.mrb[30].mxu0 }
 0x238   : > { %1167 = vst [vmem:[#allocation2 + $0xb0] sm:$0xff] %v1151_v48  ;;  %v1152_v20 = vadd.f32 %v1567_v22, %v2402_v61  ;;  %v1101_v49 = vpop.f32.mrb[31].mxu0  ;;  %v642_v61 = vmul.f32 %v1695_v24, %v635_v56 }
 0x239   : > { %1165 = vst [vmem:[#allocation2 + $0xa0] sm:$0xff] %v1149_v23  ;;  %v1150_v51 = vadd.f32 %v1101_v49, %v2394_v57 }
 0x23a   : > { %1168 = vst [vmem:[#allocation2 + $0xb8] sm:$0xff] %v1152_v20 }
 0x23b   : > { %1166 = vst [vmem:[#allocation2 + $0xa8] sm:$0xff] %v1150_v51 }
 0x23d   : > { %v1570_v25 = vpop.f32.mrb[32].mxu0 }
 0x23e   : > { %v1155_v52 = vadd.f32 %v1570_v25, %v2417_v9  ;;  %v1114_v21 = vpop.f32.mrb[33].mxu0  ;;  %v1697_v58 = vpop.eup %1696 }
 0x23f   : > { %v1153_v60 = vadd.f32 %v1114_v21, %v2407_v1  ;;  %v1571_v53 = vpop.f32.mrb[34].mxu0 }
 0x240   : > { %1171 = vst [vmem:[#allocation2 + $0xd0] sm:$0xff] %v1155_v52  ;;  %v1156_v55 = vadd.f32 %v1571_v53, %v2419_v10  ;;  %v1117_v29 = vpop.f32.mrb[35].mxu0 }
 0x241   : > { %1169 = vst [vmem:[#allocation2 + $0xc0] sm:$0xff] %v1153_v60  ;;  %v1154_v26 = vadd.f32 %v1117_v29, %v2409_v3 }
 0x242   : > { %1172 = vst [vmem:[#allocation2 + $0xd8] sm:$0xff] %v1156_v55 }
 0x243   : > { %1170 = vst [vmem:[#allocation2 + $0xc8] sm:$0xff] %v1154_v26 }
 0x245   : > { %v1574_v1 = vpop.f32.mrb[36].mxu0 }
 0x246   : > { %v1159_v62 = vadd.f32 %v1574_v1, %v2431_v17  ;;  %v1130_v63 = vpop.f32.mrb[37].mxu0  ;;  %v998_v17 = vsub.f32 0.0, %v997_v35 }
 0x247   : > { %v1575_v10 = vpop.f32.mrb[38].mxu0  ;;  %v1157_v3 = vadd.f32 %v1130_v63, %v2424_v13 }
 0x248   : > { %1175 = vst [vmem:[#allocation2 + $0xf0] sm:$0xff] %v1159_v62  ;;  %v1133_v34 = vpop.f32.mrb[39].mxu0  ;;  %v1160_v0 = vadd.f32 %v1575_v10, %v2433_v19  ;;  %v999_v5 = vmul.f32 1.442695, %v998_v17 }
 0x249   : > { %v1158_v40 = vadd.f32 %v1133_v34, %v2426_v15  ;;  %1173 = vst [vmem:[#allocation2 + $0xe0] sm:$0xff] %v1157_v3 }
 0x24a   : > { %1176 = vst [vmem:[#allocation2 + $0xf8] sm:$0xff] %v1160_v0  ;;  %1698 = vpow2.f32 %v999_v5 }
 0x24b   : > { %1174 = vst [vmem:[#allocation2 + $0xe8] sm:$0xff] %v1158_v40 }
 0x254   : > { %v1699_v45 = vpop.eup %1698 }
 0x255   : > { %v1001_v7 = vadd.f32 1.0, %v1699_v45 }
 0x257   : > { %1700 = vrcp.f32 %v1001_v7 }
 0x261   : > { %v1701_v19 = vpop.eup %1700 }
 0x262   : > { %v1004_v15 = vmul.f32 %v1701_v19, %v997_v35 }
 0x278   : > { %v613_v57 = vpop.f32.mrb[0].mxu1 }
 0x279   : > { %v633_v59 = vmul.f32 %v1697_v58, %v613_v57  ;;  %v1506_v30 = vpop.f32.mrb[1].mxu1 }
 0x27a   : > { %v616_v9 = vpop.f32.mrb[2].mxu1 }
 0x27b   : > { %v643_v36 = vmul.f32 %v642_v61, %v633_v59  ;;  %v1507_v27 = vpop.f32.mrb[3].mxu1 }
 0x27d   : > { %v644_v39 = vpack.c.bf16 %v643_v36, %v643_v36 }
 0x27f   : > { %645 = vst [vmem:[%s2230_s23] sm:$0xf] %v644_v39 }
 0x2b5   : > { %v983_v42 = vpop.xlane.xlu1 %982 }
 0x2b9   : > { %v992_v8 = vpop.xlane.xlu1 %991 }
 0x2ba   : > { %v993_v13 = vadd.f32 %v992_v8, %v983_v42 }
 0x2bc   : > { %1702 = vrcp.f32 %v993_v13 }
 0x2c6   : > { %v1703_v46 = vpop.eup %1702 }
 0x2fc   : > { %v975_v2 = vpop.f32.mrb[4].mxu1 }
 0x2fd   : > { %v995_v43 = vmul.f32 %v1703_v46, %v975_v2  ;;  %v1556_v16 = vpop.f32.mrb[5].mxu1 }
 0x2fe   : > { %v978_v56 = vpop.f32.mrb[6].mxu1 }
 0x2ff   : > { %v1005_v6 = vmul.f32 %v1004_v15, %v995_v43  ;;  %v1557_v54 = vpop.f32.mrb[7].mxu1 }
 0x301   : > { %v1006_v18 = vpack.c.bf16 %v1005_v6, %v1005_v6 }
 0x303   : > { %1007 = vst [vmem:[%s2230_s23 + $0x4] sm:$0xf] %v1006_v18 }
 0x304   : > { %1838 = shalt.err (!%p1835_p1)
}
 0x305   : > { %s1839_s13 = scalar_lea.hbm %s2497_s18, 128  ;;  %s1843_s14 = scalar_lea.hbm %s2556_s4, 512 }
 0x306   : > { %p1840_p6 = scmp.ne.s32.totalorder %s2497_s18, %s1839_s13  ;;  %p1844_p4 = scmp.lt.u32.totalorder %s2497_s18, %s2556_s4 }
 0x307   : > { %p1845_p0 = scmp.lt.u32.totalorder %s1843_s14, %s1839_s13  ;;  %p1847_p9 = scmp.lt.u32.totalorder %s1839_s13, %s2497_s18 }
 0x308   : > { %p1841_p7 = pnand %p1840_p6, %p2587_p11 }
 0x309   : > { %p1846_p2 = por %p1845_p0, %p1844_p4 }
 0x30a   : > { %p1842_p8 = pneg %p1841_p7 }
 0x30b   : > { %p1848_p13 = por %p1847_p9, %p1846_p2 }
 0x30d   : > { %p1849_p10 = pnand %p1848_p13, %p1842_p8 }
 0x30f   : > { %1852 = shalt.err (!%p1849_p10)
}
 0x310   : > { %1594 = dma.vmem_to_hbm [thread:$0]  (%p2587_p11), %s2499_s1, 128, %s2497_s18, %s1186_s19  }
 0x311 PF: > { %s2588_s8 = sld [smem:[#allocation17_spill]]  ;;  %s2589_s12 = sld [smem:[#allocation21_spill]] }
 0x312   : > { %p1614_p12 = scmp.ge.s32.totalorder %s1931_s22, 2 }
 0x317   : > { %s1216_s24 = sand.u32 1, %s2588_s8   ;;  %p2590_p3 = scmp.ne.s32.totalorder %s2589_s12, 0 }
 0x318   : > { %s1217_s23 = scalar_lea.sflag [#allocation6], %s1216_s24 }
 0x319   : > { %p1610_p5 = pnand %p1614_p12, %p2590_p3 }
 0x31b   : > { %1898 = dma.done.wait (!%p1610_p5), %s1217_s23, 128  }
 0x31c   : > { %1900 = vsyncadd (!%p1610_p5), %s1217_s23, 4294967168  ;;  %s26_s22 = sadd.s32 1, %s1931_s22   ;;  %s2591_s30 = sld [smem:[#allocation18_spill]] }
 0x31d   : > { %p23_p1 = scmp.ge.s32.totalorder %s26_s22, 6   ;;  %s2592_s17 = sld [smem:[#allocation22_spill]] }
 0x31e   : > { %s2593_s5 = sld [smem:[#allocation19_spill]]  ;;  %s2594_s0 = sld [smem:[#allocation20_spill]] }
 0x31f   : > { %s2595_s15 = smov %s1907_s16  ;;  %s2597_s18 = smov %s1923_s20 }
 0x320   : > { %s2598_s19 = smov %s1927_s21  ;;  %25 = sbr.rel (!%p23_p1) target bundleno = 14 (0xe), region = 124 }
 0x322   : > { %s2596_s16 = smov %s2591_s30 }
 0x324   : > { %s2599_s20 = smov %s2593_s5  ;;  %s2600_s21 = smov %s2594_s0 }
 0x327   :  { %1222 = vsyncpa [#allocation5], 1 }
 0x328   :  { %1224 = vsyncpa [#allocation5 + $0x1], 1 }
 0x329   :  { %1225 = vsyncpa [#allocation8], 1 }
 0x32a   :  { %1227 = vsyncpa [#allocation8 + $0x1], 1 }
 0x32b   :  { %1228 = vsyncpa [#allocation11], 1 }
 0x32c   :  { %1230 = vsyncpa [#allocation11 + $0x1], 1 }
 0x32d   :  { %1231 = vsyncpa [#allocation6], 1 }
 0x32e   :  { %1233 = vsyncpa [#allocation6 + $0x1], 1 }

</bundles_post_ra>
